<compile_context>
chip_gen: v7x
topology: tpu7x:2x2x1
jax: 0.10.0
libtpu: 0.0.40
codegen_flags: <defaults>
</compile_context>

<pallas_src>
import jax
import jax.numpy as jnp
from jax import lax
from jax.experimental import pallas as pl
from jax.experimental.pallas import tpu as pltpu

# ---- module hyper-parameters (as implied by the PyTorch code) ----
N_FEATURES = 4      # train_small_1mX.shape[2]  (small synthetic choice)
SEQ_LEN    = 8
BATCH      = 2
N_HIDDEN   = 15     # num_hidden
N_LAYERS   = 5      # num_layers

LH = N_LAYERS * N_HIDDEN              # 75  : stacked hidden width
PH = 128 * ((LH + 127) // 128)        # 128 : padded to full lane groups
G4 = 4 * PH                           # 512 : gate-major packed gate width
C1   = LH                             # lane 75 : constant 1.0 -> bias (hi) row
XOFF = LH + 1                         # lanes 76..79 : x_t
C2   = LH + 1 + N_FEATURES            # lane 80 : constant 1.0 -> bias (lo) row
N_WAVES = SEQ_LEN + N_LAYERS - 1      # 12
assert C2 < PH


def mv_lstm_kernel(x_ref, h0_ref, c0_ref, wbig_ref,
                   w1_ref, b1_ref, w2_ref, b2_ref,
                   out_ref, hn_ref, cn_ref):
    """Whole forward pass in one kernel invocation (everything resident in VMEM).

    Refs:
      x_ref    : (S, B, PH) f32  per-timestep slab: lanes [C1]=1, [XOFF:XOFF+F]=x_t, [C2]=1
      h0_ref   : (B, PH)  f32    packed initial hidden [h_0|..|h_{L-1}| 1 | x_0 | 1 | 0]
      c0_ref   : (B, PH)  f32    packed initial cell (pad lanes zero)
      wbig_ref : (PH, 4*PH) bf16 fused recurrent + inter-layer + input + bias weights
      w1_ref   : (PH, 10) f32    head Linear1 (nonzero rows only for top layer)
      b1_ref   : (1, 10), w2_ref : (10, 1), b2_ref : (1, 1)
      out_ref  : (B, 1)
      hn_ref   : (B, PH)  packed final hidden
      cn_ref   : (B, PH)  packed final cell
    """
    H, S, L = N_HIDDEN, SEQ_LEN, N_LAYERS
    B = h0_ref.shape[0]

    # ---- hoisted, off the recurrent critical path --------------------------
    wb = wbig_ref[...]                                       # (PH, 4*PH) bf16, invariant
    lane = lax.broadcasted_iota(jnp.int32, (B, PH), 1)

    # Per-wave live-lane (lo, hi) windows (static), masks precomputed & deduped.
    windows = []
    for w in range(N_WAVES):
        lo = max(0, w - S + 1) * H
        hi = (min(w, L - 1) + 1) * H
        windows.append((lo, hi))
    masks = {}
    for lo, hi in sorted(set(windows) | {(0, LH)}):
        m = lane < hi
        if lo > 0:
            m = m & (lane >= lo)
        masks[(lo, hi)] = m
    lane_lt_lh = masks[(0, LH)]

    h = h0_ref[...]                                          # (B, PH) f32
    c = c0_ref[...]                                          # (B, PH) f32

    # ---- wavefront over (layer, time): 12 waves, statically unrolled -------
    for w in range(N_WAVES):
        lo, hi = windows[w]
        live = masks[(lo, hi)]

        # Single fused bf16 matmul (f32 accumulate): recurrent + inter-layer +
        # layer-0 input + biases, all via the packed lanes of h.  No post-adds.
        gates = jnp.dot(h.astype(jnp.bfloat16), wb,
                        preferred_element_type=jnp.float32)  # (B, 4*PH)

        # gate-major packing: each gate group is one aligned 128-lane block.
        i_a = jax.nn.sigmoid(gates[:, 0 * PH:1 * PH])
        f_a = jax.nn.sigmoid(gates[:, 1 * PH:2 * PH])
        g_a = jnp.tanh(      gates[:, 2 * PH:3 * PH])
        o_a = jax.nn.sigmoid(gates[:, 3 * PH:4 * PH])

        c_new = f_a * c + i_a * g_a
        h_new = o_a * jnp.tanh(c_new)

        # "other" = value kept on non-live lanes; also refreshes the constant /
        # x lanes (>= LH) for the next wave.  Depends only on the pre-update h
        # and a VMEM load, so it overlaps the matmul above.
        if w + 1 < S:
            nxt = x_ref[w + 1]                               # (B, PH): [0..0 |1| x_{w+1} |1| 0]
            if lo == 0 and hi == LH:                         # interior wave: all LH lanes live
                other = nxt
            else:
                other = jnp.where(lane_lt_lh, h, nxt)
        else:
            # x exhausted: layer 0 is no longer live, stale x lanes are harmless;
            # constant-1 lanes persist because live never covers lanes >= LH.
            other = h

        h = jnp.where(live, h_new, other)                    # single select on the chain
        c = jnp.where(live, c_new, c)

    hn_ref[...] = h
    cn_ref[...] = c

    # MLP head on the top layer's last-step output.  w1 rows >= LH are zero, so the
    # constant / x lanes of h cannot contaminate the result.
    y1 = jnp.maximum(
        jnp.dot(h, w1_ref[...], preferred_element_type=jnp.float32) + b1_ref[...],
        0.0)
    out_ref[...] = (jnp.dot(y1, w2_ref[...], preferred_element_type=jnp.float32)
                    + b2_ref[...])


@jax.jit
def mv_lstm_forward(x, h0, c0, packed):
    """x: (B, S, F) batch_first, h0/c0: (L, B, H). Returns (out, (h_n, c_n))."""
    w_big, w1_big, b1, w2, b2 = packed
    B, S, F = x.shape

    # Per-timestep slab driving the folded input/bias lanes of h.
    xslab = jnp.zeros((S, B, PH), jnp.float32)
    xslab = xslab.at[:, :, C1].set(1.0)
    xslab = xslab.at[:, :, C2].set(1.0)
    xslab = xslab.at[:, :, XOFF:XOFF + F].set(jnp.transpose(x, (1, 0, 2)))

    def pack_state(s):                                      # (L,B,H) -> (B,PH)
        s = jnp.transpose(s, (1, 0, 2)).reshape(B, LH)
        return jnp.zeros((B, PH), jnp.float32).at[:, :LH].set(s)

    h0p = pack_state(h0) + xslab[0]                         # lanes >= LH: [1 | x_0 | 1 | 0]
    c0p = pack_state(c0)

    vmem = lambda: pl.BlockSpec(memory_space=pltpu.MemorySpace.VMEM)
    out, hnp, cnp = pl.pallas_call(
        mv_lstm_kernel,
        out_shape=(jax.ShapeDtypeStruct((B, 1), jnp.float32),
                   jax.ShapeDtypeStruct((B, PH), jnp.float32),
                   jax.ShapeDtypeStruct((B, PH), jnp.float32)),
        in_specs=[vmem() for _ in range(8)],
        out_specs=(vmem(), vmem(), vmem()),
    )(xslab, h0p, c0p, w_big, w1_big, b1, w2, b2)

    def unpack_state(sp):                                   # (B,PH) -> (L,B,H)
        return jnp.transpose(sp[:, :LH].reshape(B, N_LAYERS, N_HIDDEN), (1, 0, 2))

    return out, (unpack_state(hnp), unpack_state(cnp))


def init_params(key):
    """Per-layer LSTM params (PyTorch-style U(-1/sqrt(H), 1/sqrt(H))) + head params."""
    H, F, L = N_HIDDEN, N_FEATURES, N_LAYERS
    s = 1.0 / jnp.sqrt(jnp.float32(H))
    ks = jax.random.split(key, 4 * L + 4)
    u = lambda k, shape: jax.random.uniform(k, shape, jnp.float32, -s, s)

    w_ih, w_hh, b = [], [], []
    for l in range(L):
        in_dim = F if l == 0 else H
        k0, k1, k2, k3 = ks[4 * l:4 * l + 4]
        w_ih.append(u(k0, (in_dim, 4 * H)))                 # x @ w_ih (already transposed)
        w_hh.append(u(k1, (H, 4 * H)))                      # h @ w_hh
        b.append(u(k2, (4 * H,)) + u(k3, (4 * H,)))         # b_ih + b_hh
    w1 = u(ks[4 * L + 0], (H, 10))
    b1 = u(ks[4 * L + 1], (1, 10)) * 0.1
    w2 = u(ks[4 * L + 2], (10, 1))
    b2 = u(ks[4 * L + 3], (1, 1)) * 0.1
    return (w_ih, w_hh, b, w1, b1, w2, b2)


def pack_params(params):
    """Build the gate-major, lane-padded fused bf16 weight matrix used by the kernel."""
    w_ih, w_hh, b, w1, b1, w2, b2 = params
    H, F, L = N_HIDDEN, N_FEATURES, N_LAYERS

    w_big = jnp.zeros((PH, G4), jnp.float32)
    b_all = jnp.zeros((G4,), jnp.float32)
    for g in range(4):                                      # gate order i, f, g, o
        col0 = g * PH
        for l in range(L):
            col = col0 + l * H
            w_big = w_big.at[l * H:(l + 1) * H, col:col + H].set(
                w_hh[l][:, g * H:(g + 1) * H])
            if l >= 1:
                w_big = w_big.at[(l - 1) * H:l * H, col:col + H].set(
                    w_ih[l][:, g * H:(g + 1) * H])
            b_all = b_all.at[col:col + H].set(b[l][g * H:(g + 1) * H])
        # layer-0 input weights live in rows XOFF..XOFF+F-1 (layer-0 columns only)
        w_big = w_big.at[XOFF:XOFF + F, col0:col0 + H].set(
            w_ih[0][:, g * H:(g + 1) * H])

    # Two-part bf16 bias split: row C1 (* lane value 1.0) + row C2 recovers the f32
    # bias to ~1e-6 despite the bf16 MXU pass.
    b_hi = b_all.astype(jnp.bfloat16)
    b_lo = (b_all - b_hi.astype(jnp.float32)).astype(jnp.bfloat16)

    w_big_bf16 = w_big.astype(jnp.bfloat16)
    w_big_bf16 = w_big_bf16.at[C1, :].set(b_hi)
    w_big_bf16 = w_big_bf16.at[C2, :].set(b_lo)

    w1_big = jnp.zeros((PH, 10), jnp.float32).at[(L - 1) * H:L * H, :].set(w1)
    return (w_big_bf16, w1_big, b1, w2, b2)


def mv_lstm_reference(x, h0, c0, params):
    """Pure-JAX reference matching torch.nn.LSTM(batch_first=True) + head semantics."""
    w_ih, w_hh, b, w1, b1, w2, b2 = params
    H = N_HIDDEN
    seq = x
    hs, cs = [], []
    for l in range(N_LAYERS):
        h, c = h0[l], c0[l]
        outs = []
        for t in range(SEQ_LEN):
            g = seq[:, t, :] @ w_ih[l] + h @ w_hh[l] + b[l]
            i_g = jax.nn.sigmoid(g[:, 0 * H:1 * H])
            f_g = jax.nn.sigmoid(g[:, 1 * H:2 * H])
            g_g = jnp.tanh(g[:, 2 * H:3 * H])
            o_g = jax.nn.sigmoid(g[:, 3 * H:4 * H])
            c = f_g * c + i_g * g_g
            h = o_g * jnp.tanh(c)
            outs.append(h)
        seq = jnp.stack(outs, axis=1)
        hs.append(h)
        cs.append(c)
    last = seq[:, -1, :]
    y = jnp.maximum(last @ w1 + b1, 0.0) @ w2 + b2
    return y, (jnp.stack(hs), jnp.stack(cs))


if __name__ == "__main__":
    key = jax.random.PRNGKey(0)
    k_x, k_p = jax.random.split(key)

    x = jax.random.normal(k_x, (BATCH, SEQ_LEN, N_FEATURES), jnp.float32)
    # init_hidden(batch_size): zeros of shape (n_layers, batch, n_hidden)
    h0 = jnp.zeros((N_LAYERS, BATCH, N_HIDDEN), jnp.float32)
    c0 = jnp.zeros((N_LAYERS, BATCH, N_HIDDEN), jnp.float32)

    params = init_params(k_p)
    packed = pack_params(params)

    out, (h_n, c_n) = mv_lstm_forward(x, h0, c0, packed)
    jax.block_until_ready((out, h_n, c_n))

    ref_out, (ref_h, ref_c) = mv_lstm_reference(x, h0, c0, params)
    assert out.shape == (BATCH, 1)
    assert h_n.shape == (N_LAYERS, BATCH, N_HIDDEN)
    assert c_n.shape == (N_LAYERS, BATCH, N_HIDDEN)
    # Tolerance accounts for bf16 MXU inputs on the 12-deep recurrent chain
    # (the f32 reference may or may not itself use bf16 matmul passes).
    assert jnp.allclose(out, ref_out, atol=5e-3, rtol=5e-3)
    assert jnp.allclose(h_n, ref_h, atol=5e-3, rtol=5e-3)
    assert jnp.allclose(c_n, ref_c, atol=5e-3, rtol=5e-3)

    print("KERNEL_OK")
</pallas_src>

<mosaic_0001>
module attributes {stable_mosaic.version = 11 : i64} {
  func.func @mv_lstm_kernel(%arg0: memref<8x2x128xf32, #tpu.memory_space<vmem>>, %arg1: memref<2x128xf32, #tpu.memory_space<vmem>>, %arg2: memref<2x128xf32, #tpu.memory_space<vmem>>, %arg3: memref<128x512xbf16, #tpu.memory_space<vmem>>, %arg4: memref<128x10xf32, #tpu.memory_space<vmem>>, %arg5: memref<1x10xf32, #tpu.memory_space<vmem>>, %arg6: memref<10x1xf32, #tpu.memory_space<vmem>>, %arg7: memref<1x1xf32, #tpu.memory_space<vmem>>, %arg8: memref<2x1xf32, #tpu.memory_space<vmem>>, %arg9: memref<2x128xf32, #tpu.memory_space<vmem>>, %arg10: memref<2x128xf32, #tpu.memory_space<vmem>>) attributes {dimension_semantics = [], scalar_prefetch = 0 : i64, scratch_operands = 0 : i64, tpu.core_type = #tpu.core_type<tc>} {
    %c0 = arith.constant 0 : index
    %c0_0 = arith.constant 0 : index
    %0 = vector.load %arg3[%c0, %c0_0] : memref<128x512xbf16, #tpu.memory_space<vmem>>, vector<128x512xbf16>
    %1 = tpu.iota {dimensions = array<i32: 1>} : vector<2x128xi32>
    %c15_i32 = arith.constant 15 : i32
    %2 = vector.broadcast %c15_i32 : i32 to vector<2x128xi32>
    %3 = arith.cmpi slt, %1, %2 : vector<2x128xi32>
    %c30_i32 = arith.constant 30 : i32
    %4 = vector.broadcast %c30_i32 : i32 to vector<2x128xi32>
    %5 = arith.cmpi slt, %1, %4 : vector<2x128xi32>
    %c45_i32 = arith.constant 45 : i32
    %6 = vector.broadcast %c45_i32 : i32 to vector<2x128xi32>
    %7 = arith.cmpi slt, %1, %6 : vector<2x128xi32>
    %c60_i32 = arith.constant 60 : i32
    %8 = vector.broadcast %c60_i32 : i32 to vector<2x128xi32>
    %9 = arith.cmpi slt, %1, %8 : vector<2x128xi32>
    %c75_i32 = arith.constant 75 : i32
    %10 = vector.broadcast %c75_i32 : i32 to vector<2x128xi32>
    %11 = arith.cmpi slt, %1, %10 : vector<2x128xi32>
    %c75_i32_1 = arith.constant 75 : i32
    %12 = vector.broadcast %c75_i32_1 : i32 to vector<2x128xi32>
    %13 = arith.cmpi slt, %1, %12 : vector<2x128xi32>
    %c15_i32_2 = arith.constant 15 : i32
    %14 = vector.broadcast %c15_i32_2 : i32 to vector<2x128xi32>
    %15 = arith.cmpi sge, %1, %14 : vector<2x128xi32>
    %16 = arith.andi %13, %15 : vector<2x128xi1>
    %c75_i32_3 = arith.constant 75 : i32
    %17 = vector.broadcast %c75_i32_3 : i32 to vector<2x128xi32>
    %18 = arith.cmpi slt, %1, %17 : vector<2x128xi32>
    %c30_i32_4 = arith.constant 30 : i32
    %19 = vector.broadcast %c30_i32_4 : i32 to vector<2x128xi32>
    %20 = arith.cmpi sge, %1, %19 : vector<2x128xi32>
    %21 = arith.andi %18, %20 : vector<2x128xi1>
    %c75_i32_5 = arith.constant 75 : i32
    %22 = vector.broadcast %c75_i32_5 : i32 to vector<2x128xi32>
    %23 = arith.cmpi slt, %1, %22 : vector<2x128xi32>
    %c45_i32_6 = arith.constant 45 : i32
    %24 = vector.broadcast %c45_i32_6 : i32 to vector<2x128xi32>
    %25 = arith.cmpi sge, %1, %24 : vector<2x128xi32>
    %26 = arith.andi %23, %25 : vector<2x128xi1>
    %c75_i32_7 = arith.constant 75 : i32
    %27 = vector.broadcast %c75_i32_7 : i32 to vector<2x128xi32>
    %28 = arith.cmpi slt, %1, %27 : vector<2x128xi32>
    %c60_i32_8 = arith.constant 60 : i32
    %29 = vector.broadcast %c60_i32_8 : i32 to vector<2x128xi32>
    %30 = arith.cmpi sge, %1, %29 : vector<2x128xi32>
    %31 = arith.andi %28, %30 : vector<2x128xi1>
    %c0_9 = arith.constant 0 : index
    %c0_10 = arith.constant 0 : index
    %32 = vector.load %arg1[%c0_9, %c0_10] : memref<2x128xf32, #tpu.memory_space<vmem>>, vector<2x128xf32>
    %c0_11 = arith.constant 0 : index
    %c0_12 = arith.constant 0 : index
    %33 = vector.load %arg2[%c0_11, %c0_12] : memref<2x128xf32, #tpu.memory_space<vmem>>, vector<2x128xf32>
    %34 = arith.truncf %32 : vector<2x128xf32> to vector<2x128xbf16>
    %cst = arith.constant dense<0.000000e+00> : vector<2x512xf32>
    %35 = tpu.matmul %34, %0, %cst {dimension_numbers = #tpu.dot_dimension_numbers<[1], [0], [0], [1], [0, 0, 1, 1], [], []>} : vector<2x128xbf16>, vector<128x512xbf16>, vector<2x512xf32> -> vector<2x512xf32>
    %36 = vector.extract_strided_slice %35 {offsets = [0, 0], sizes = [2, 128], strides = [1, 1]} : vector<2x512xf32> to vector<2x128xf32>
    %37 = arith.negf %36 : vector<2x128xf32>
    %38 = math.exp %37 : vector<2x128xf32>
    %cst_13 = arith.constant 1.000000e+00 : f32
    %39 = vector.broadcast %cst_13 : f32 to vector<2x128xf32>
    %40 = arith.addf %39, %38 : vector<2x128xf32>
    %41 = arith.divf %39, %40 : vector<2x128xf32>
    %42 = vector.extract_strided_slice %35 {offsets = [0, 128], sizes = [2, 128], strides = [1, 1]} : vector<2x512xf32> to vector<2x128xf32>
    %43 = arith.negf %42 : vector<2x128xf32>
    %44 = math.exp %43 : vector<2x128xf32>
    %cst_14 = arith.constant 1.000000e+00 : f32
    %45 = vector.broadcast %cst_14 : f32 to vector<2x128xf32>
    %46 = arith.addf %45, %44 : vector<2x128xf32>
    %47 = arith.divf %45, %46 : vector<2x128xf32>
    %48 = vector.extract_strided_slice %35 {offsets = [0, 256], sizes = [2, 128], strides = [1, 1]} : vector<2x512xf32> to vector<2x128xf32>
    %49 = math.tanh %48 : vector<2x128xf32>
    %50 = vector.extract_strided_slice %35 {offsets = [0, 384], sizes = [2, 128], strides = [1, 1]} : vector<2x512xf32> to vector<2x128xf32>
    %51 = arith.negf %50 : vector<2x128xf32>
    %52 = math.exp %51 : vector<2x128xf32>
    %cst_15 = arith.constant 1.000000e+00 : f32
    %53 = vector.broadcast %cst_15 : f32 to vector<2x128xf32>
    %54 = arith.addf %53, %52 : vector<2x128xf32>
    %55 = arith.divf %53, %54 : vector<2x128xf32>
    %56 = arith.mulf %47, %33 : vector<2x128xf32>
    %57 = arith.mulf %41, %49 : vector<2x128xf32>
    %58 = arith.addf %56, %57 : vector<2x128xf32>
    %59 = math.tanh %58 : vector<2x128xf32>
    %60 = arith.mulf %55, %59 : vector<2x128xf32>
    %c1 = arith.constant 1 : index
    %c0_16 = arith.constant 0 : index
    %c0_17 = arith.constant 0 : index
    %61 = vector.load %arg0[%c1, %c0_16, %c0_17] : memref<8x2x128xf32, #tpu.memory_space<vmem>>, vector<1x2x128xf32>
    %62 = vector.shape_cast %61 : vector<1x2x128xf32> to vector<2x128xf32>
    %63 = arith.select %11, %32, %62 : vector<2x128xi1>, vector<2x128xf32>
    %64 = arith.select %3, %60, %63 : vector<2x128xi1>, vector<2x128xf32>
    %65 = arith.select %3, %58, %33 : vector<2x128xi1>, vector<2x128xf32>
    %66 = arith.truncf %64 : vector<2x128xf32> to vector<2x128xbf16>
    %cst_18 = arith.constant dense<0.000000e+00> : vector<2x512xf32>
    %67 = tpu.matmul %66, %0, %cst_18 {dimension_numbers = #tpu.dot_dimension_numbers<[1], [0], [0], [1], [0, 0, 1, 1], [], []>} : vector<2x128xbf16>, vector<128x512xbf16>, vector<2x512xf32> -> vector<2x512xf32>
    %68 = vector.extract_strided_slice %67 {offsets = [0, 0], sizes = [2, 128], strides = [1, 1]} : vector<2x512xf32> to vector<2x128xf32>
    %69 = arith.negf %68 : vector<2x128xf32>
    %70 = math.exp %69 : vector<2x128xf32>
    %cst_19 = arith.constant 1.000000e+00 : f32
    %71 = vector.broadcast %cst_19 : f32 to vector<2x128xf32>
    %72 = arith.addf %71, %70 : vector<2x128xf32>
    %73 = arith.divf %71, %72 : vector<2x128xf32>
    %74 = vector.extract_strided_slice %67 {offsets = [0, 128], sizes = [2, 128], strides = [1, 1]} : vector<2x512xf32> to vector<2x128xf32>
    %75 = arith.negf %74 : vector<2x128xf32>
    %76 = math.exp %75 : vector<2x128xf32>
    %cst_20 = arith.constant 1.000000e+00 : f32
    %77 = vector.broadcast %cst_20 : f32 to vector<2x128xf32>
    %78 = arith.addf %77, %76 : vector<2x128xf32>
    %79 = arith.divf %77, %78 : vector<2x128xf32>
    %80 = vector.extract_strided_slice %67 {offsets = [0, 256], sizes = [2, 128], strides = [1, 1]} : vector<2x512xf32> to vector<2x128xf32>
    %81 = math.tanh %80 : vector<2x128xf32>
    %82 = vector.extract_strided_slice %67 {offsets = [0, 384], sizes = [2, 128], strides = [1, 1]} : vector<2x512xf32> to vector<2x128xf32>
    %83 = arith.negf %82 : vector<2x128xf32>
    %84 = math.exp %83 : vector<2x128xf32>
    %cst_21 = arith.constant 1.000000e+00 : f32
    %85 = vector.broadcast %cst_21 : f32 to vector<2x128xf32>
    %86 = arith.addf %85, %84 : vector<2x128xf32>
    %87 = arith.divf %85, %86 : vector<2x128xf32>
    %88 = arith.mulf %79, %65 : vector<2x128xf32>
    %89 = arith.mulf %73, %81 : vector<2x128xf32>
    %90 = arith.addf %88, %89 : vector<2x128xf32>
    %91 = math.tanh %90 : vector<2x128xf32>
    %92 = arith.mulf %87, %91 : vector<2x128xf32>
    %c2 = arith.constant 2 : index
    %c0_22 = arith.constant 0 : index
    %c0_23 = arith.constant 0 : index
    %93 = vector.load %arg0[%c2, %c0_22, %c0_23] : memref<8x2x128xf32, #tpu.memory_space<vmem>>, vector<1x2x128xf32>
    %94 = vector.shape_cast %93 : vector<1x2x128xf32> to vector<2x128xf32>
    %95 = arith.select %11, %64, %94 : vector<2x128xi1>, vector<2x128xf32>
    %96 = arith.select %5, %92, %95 : vector<2x128xi1>, vector<2x128xf32>
    %97 = arith.select %5, %90, %65 : vector<2x128xi1>, vector<2x128xf32>
    %98 = arith.truncf %96 : vector<2x128xf32> to vector<2x128xbf16>
    %cst_24 = arith.constant dense<0.000000e+00> : vector<2x512xf32>
    %99 = tpu.matmul %98, %0, %cst_24 {dimension_numbers = #tpu.dot_dimension_numbers<[1], [0], [0], [1], [0, 0, 1, 1], [], []>} : vector<2x128xbf16>, vector<128x512xbf16>, vector<2x512xf32> -> vector<2x512xf32>
    %100 = vector.extract_strided_slice %99 {offsets = [0, 0], sizes = [2, 128], strides = [1, 1]} : vector<2x512xf32> to vector<2x128xf32>
    %101 = arith.negf %100 : vector<2x128xf32>
    %102 = math.exp %101 : vector<2x128xf32>
    %cst_25 = arith.constant 1.000000e+00 : f32
    %103 = vector.broadcast %cst_25 : f32 to vector<2x128xf32>
    %104 = arith.addf %103, %102 : vector<2x128xf32>
    %105 = arith.divf %103, %104 : vector<2x128xf32>
    %106 = vector.extract_strided_slice %99 {offsets = [0, 128], sizes = [2, 128], strides = [1, 1]} : vector<2x512xf32> to vector<2x128xf32>
    %107 = arith.negf %106 : vector<2x128xf32>
    %108 = math.exp %107 : vector<2x128xf32>
    %cst_26 = arith.constant 1.000000e+00 : f32
    %109 = vector.broadcast %cst_26 : f32 to vector<2x128xf32>
    %110 = arith.addf %109, %108 : vector<2x128xf32>
    %111 = arith.divf %109, %110 : vector<2x128xf32>
    %112 = vector.extract_strided_slice %99 {offsets = [0, 256], sizes = [2, 128], strides = [1, 1]} : vector<2x512xf32> to vector<2x128xf32>
    %113 = math.tanh %112 : vector<2x128xf32>
    %114 = vector.extract_strided_slice %99 {offsets = [0, 384], sizes = [2, 128], strides = [1, 1]} : vector<2x512xf32> to vector<2x128xf32>
    %115 = arith.negf %114 : vector<2x128xf32>
    %116 = math.exp %115 : vector<2x128xf32>
    %cst_27 = arith.constant 1.000000e+00 : f32
    %117 = vector.broadcast %cst_27 : f32 to vector<2x128xf32>
    %118 = arith.addf %117, %116 : vector<2x128xf32>
    %119 = arith.divf %117, %118 : vector<2x128xf32>
    %120 = arith.mulf %111, %97 : vector<2x128xf32>
    %121 = arith.mulf %105, %113 : vector<2x128xf32>
    %122 = arith.addf %120, %121 : vector<2x128xf32>
    %123 = math.tanh %122 : vector<2x128xf32>
    %124 = arith.mulf %119, %123 : vector<2x128xf32>
    %c3 = arith.constant 3 : index
    %c0_28 = arith.constant 0 : index
    %c0_29 = arith.constant 0 : index
    %125 = vector.load %arg0[%c3, %c0_28, %c0_29] : memref<8x2x128xf32, #tpu.memory_space<vmem>>, vector<1x2x128xf32>
    %126 = vector.shape_cast %125 : vector<1x2x128xf32> to vector<2x128xf32>
    %127 = arith.select %11, %96, %126 : vector<2x128xi1>, vector<2x128xf32>
    %128 = arith.select %7, %124, %127 : vector<2x128xi1>, vector<2x128xf32>
    %129 = arith.select %7, %122, %97 : vector<2x128xi1>, vector<2x128xf32>
    %130 = arith.truncf %128 : vector<2x128xf32> to vector<2x128xbf16>
    %cst_30 = arith.constant dense<0.000000e+00> : vector<2x512xf32>
    %131 = tpu.matmul %130, %0, %cst_30 {dimension_numbers = #tpu.dot_dimension_numbers<[1], [0], [0], [1], [0, 0, 1, 1], [], []>} : vector<2x128xbf16>, vector<128x512xbf16>, vector<2x512xf32> -> vector<2x512xf32>
    %132 = vector.extract_strided_slice %131 {offsets = [0, 0], sizes = [2, 128], strides = [1, 1]} : vector<2x512xf32> to vector<2x128xf32>
    %133 = arith.negf %132 : vector<2x128xf32>
    %134 = math.exp %133 : vector<2x128xf32>
    %cst_31 = arith.constant 1.000000e+00 : f32
    %135 = vector.broadcast %cst_31 : f32 to vector<2x128xf32>
    %136 = arith.addf %135, %134 : vector<2x128xf32>
    %137 = arith.divf %135, %136 : vector<2x128xf32>
    %138 = vector.extract_strided_slice %131 {offsets = [0, 128], sizes = [2, 128], strides = [1, 1]} : vector<2x512xf32> to vector<2x128xf32>
    %139 = arith.negf %138 : vector<2x128xf32>
    %140 = math.exp %139 : vector<2x128xf32>
    %cst_32 = arith.constant 1.000000e+00 : f32
    %141 = vector.broadcast %cst_32 : f32 to vector<2x128xf32>
    %142 = arith.addf %141, %140 : vector<2x128xf32>
    %143 = arith.divf %141, %142 : vector<2x128xf32>
    %144 = vector.extract_strided_slice %131 {offsets = [0, 256], sizes = [2, 128], strides = [1, 1]} : vector<2x512xf32> to vector<2x128xf32>
    %145 = math.tanh %144 : vector<2x128xf32>
    %146 = vector.extract_strided_slice %131 {offsets = [0, 384], sizes = [2, 128], strides = [1, 1]} : vector<2x512xf32> to vector<2x128xf32>
    %147 = arith.negf %146 : vector<2x128xf32>
    %148 = math.exp %147 : vector<2x128xf32>
    %cst_33 = arith.constant 1.000000e+00 : f32
    %149 = vector.broadcast %cst_33 : f32 to vector<2x128xf32>
    %150 = arith.addf %149, %148 : vector<2x128xf32>
    %151 = arith.divf %149, %150 : vector<2x128xf32>
    %152 = arith.mulf %143, %129 : vector<2x128xf32>
    %153 = arith.mulf %137, %145 : vector<2x128xf32>
    %154 = arith.addf %152, %153 : vector<2x128xf32>
    %155 = math.tanh %154 : vector<2x128xf32>
    %156 = arith.mulf %151, %155 : vector<2x128xf32>
    %c4 = arith.constant 4 : index
    %c0_34 = arith.constant 0 : index
    %c0_35 = arith.constant 0 : index
    %157 = vector.load %arg0[%c4, %c0_34, %c0_35] : memref<8x2x128xf32, #tpu.memory_space<vmem>>, vector<1x2x128xf32>
    %158 = vector.shape_cast %157 : vector<1x2x128xf32> to vector<2x128xf32>
    %159 = arith.select %11, %128, %158 : vector<2x128xi1>, vector<2x128xf32>
    %160 = arith.select %9, %156, %159 : vector<2x128xi1>, vector<2x128xf32>
    %161 = arith.select %9, %154, %129 : vector<2x128xi1>, vector<2x128xf32>
    %162 = arith.truncf %160 : vector<2x128xf32> to vector<2x128xbf16>
    %cst_36 = arith.constant dense<0.000000e+00> : vector<2x512xf32>
    %163 = tpu.matmul %162, %0, %cst_36 {dimension_numbers = #tpu.dot_dimension_numbers<[1], [0], [0], [1], [0, 0, 1, 1], [], []>} : vector<2x128xbf16>, vector<128x512xbf16>, vector<2x512xf32> -> vector<2x512xf32>
    %164 = vector.extract_strided_slice %163 {offsets = [0, 0], sizes = [2, 128], strides = [1, 1]} : vector<2x512xf32> to vector<2x128xf32>
    %165 = arith.negf %164 : vector<2x128xf32>
    %166 = math.exp %165 : vector<2x128xf32>
    %cst_37 = arith.constant 1.000000e+00 : f32
    %167 = vector.broadcast %cst_37 : f32 to vector<2x128xf32>
    %168 = arith.addf %167, %166 : vector<2x128xf32>
    %169 = arith.divf %167, %168 : vector<2x128xf32>
    %170 = vector.extract_strided_slice %163 {offsets = [0, 128], sizes = [2, 128], strides = [1, 1]} : vector<2x512xf32> to vector<2x128xf32>
    %171 = arith.negf %170 : vector<2x128xf32>
    %172 = math.exp %171 : vector<2x128xf32>
    %cst_38 = arith.constant 1.000000e+00 : f32
    %173 = vector.broadcast %cst_38 : f32 to vector<2x128xf32>
    %174 = arith.addf %173, %172 : vector<2x128xf32>
    %175 = arith.divf %173, %174 : vector<2x128xf32>
    %176 = vector.extract_strided_slice %163 {offsets = [0, 256], sizes = [2, 128], strides = [1, 1]} : vector<2x512xf32> to vector<2x128xf32>
    %177 = math.tanh %176 : vector<2x128xf32>
    %178 = vector.extract_strided_slice %163 {offsets = [0, 384], sizes = [2, 128], strides = [1, 1]} : vector<2x512xf32> to vector<2x128xf32>
    %179 = arith.negf %178 : vector<2x128xf32>
    %180 = math.exp %179 : vector<2x128xf32>
    %cst_39 = arith.constant 1.000000e+00 : f32
    %181 = vector.broadcast %cst_39 : f32 to vector<2x128xf32>
    %182 = arith.addf %181, %180 : vector<2x128xf32>
    %183 = arith.divf %181, %182 : vector<2x128xf32>
    %184 = arith.mulf %175, %161 : vector<2x128xf32>
    %185 = arith.mulf %169, %177 : vector<2x128xf32>
    %186 = arith.addf %184, %185 : vector<2x128xf32>
    %187 = math.tanh %186 : vector<2x128xf32>
    %188 = arith.mulf %183, %187 : vector<2x128xf32>
    %c5 = arith.constant 5 : index
    %c0_40 = arith.constant 0 : index
    %c0_41 = arith.constant 0 : index
    %189 = vector.load %arg0[%c5, %c0_40, %c0_41] : memref<8x2x128xf32, #tpu.memory_space<vmem>>, vector<1x2x128xf32>
    %190 = vector.shape_cast %189 : vector<1x2x128xf32> to vector<2x128xf32>
    %191 = arith.select %11, %188, %190 : vector<2x128xi1>, vector<2x128xf32>
    %192 = arith.select %11, %186, %161 : vector<2x128xi1>, vector<2x128xf32>
    %193 = arith.truncf %191 : vector<2x128xf32> to vector<2x128xbf16>
    %cst_42 = arith.constant dense<0.000000e+00> : vector<2x512xf32>
    %194 = tpu.matmul %193, %0, %cst_42 {dimension_numbers = #tpu.dot_dimension_numbers<[1], [0], [0], [1], [0, 0, 1, 1], [], []>} : vector<2x128xbf16>, vector<128x512xbf16>, vector<2x512xf32> -> vector<2x512xf32>
    %195 = vector.extract_strided_slice %194 {offsets = [0, 0], sizes = [2, 128], strides = [1, 1]} : vector<2x512xf32> to vector<2x128xf32>
    %196 = arith.negf %195 : vector<2x128xf32>
    %197 = math.exp %196 : vector<2x128xf32>
    %cst_43 = arith.constant 1.000000e+00 : f32
    %198 = vector.broadcast %cst_43 : f32 to vector<2x128xf32>
    %199 = arith.addf %198, %197 : vector<2x128xf32>
    %200 = arith.divf %198, %199 : vector<2x128xf32>
    %201 = vector.extract_strided_slice %194 {offsets = [0, 128], sizes = [2, 128], strides = [1, 1]} : vector<2x512xf32> to vector<2x128xf32>
    %202 = arith.negf %201 : vector<2x128xf32>
    %203 = math.exp %202 : vector<2x128xf32>
    %cst_44 = arith.constant 1.000000e+00 : f32
    %204 = vector.broadcast %cst_44 : f32 to vector<2x128xf32>
    %205 = arith.addf %204, %203 : vector<2x128xf32>
    %206 = arith.divf %204, %205 : vector<2x128xf32>
    %207 = vector.extract_strided_slice %194 {offsets = [0, 256], sizes = [2, 128], strides = [1, 1]} : vector<2x512xf32> to vector<2x128xf32>
    %208 = math.tanh %207 : vector<2x128xf32>
    %209 = vector.extract_strided_slice %194 {offsets = [0, 384], sizes = [2, 128], strides = [1, 1]} : vector<2x512xf32> to vector<2x128xf32>
    %210 = arith.negf %209 : vector<2x128xf32>
    %211 = math.exp %210 : vector<2x128xf32>
    %cst_45 = arith.constant 1.000000e+00 : f32
    %212 = vector.broadcast %cst_45 : f32 to vector<2x128xf32>
    %213 = arith.addf %212, %211 : vector<2x128xf32>
    %214 = arith.divf %212, %213 : vector<2x128xf32>
    %215 = arith.mulf %206, %192 : vector<2x128xf32>
    %216 = arith.mulf %200, %208 : vector<2x128xf32>
    %217 = arith.addf %215, %216 : vector<2x128xf32>
    %218 = math.tanh %217 : vector<2x128xf32>
    %219 = arith.mulf %214, %218 : vector<2x128xf32>
    %c6 = arith.constant 6 : index
    %c0_46 = arith.constant 0 : index
    %c0_47 = arith.constant 0 : index
    %220 = vector.load %arg0[%c6, %c0_46, %c0_47] : memref<8x2x128xf32, #tpu.memory_space<vmem>>, vector<1x2x128xf32>
    %221 = vector.shape_cast %220 : vector<1x2x128xf32> to vector<2x128xf32>
    %222 = arith.select %11, %219, %221 : vector<2x128xi1>, vector<2x128xf32>
    %223 = arith.select %11, %217, %192 : vector<2x128xi1>, vector<2x128xf32>
    %224 = arith.truncf %222 : vector<2x128xf32> to vector<2x128xbf16>
    %cst_48 = arith.constant dense<0.000000e+00> : vector<2x512xf32>
    %225 = tpu.matmul %224, %0, %cst_48 {dimension_numbers = #tpu.dot_dimension_numbers<[1], [0], [0], [1], [0, 0, 1, 1], [], []>} : vector<2x128xbf16>, vector<128x512xbf16>, vector<2x512xf32> -> vector<2x512xf32>
    %226 = vector.extract_strided_slice %225 {offsets = [0, 0], sizes = [2, 128], strides = [1, 1]} : vector<2x512xf32> to vector<2x128xf32>
    %227 = arith.negf %226 : vector<2x128xf32>
    %228 = math.exp %227 : vector<2x128xf32>
    %cst_49 = arith.constant 1.000000e+00 : f32
    %229 = vector.broadcast %cst_49 : f32 to vector<2x128xf32>
    %230 = arith.addf %229, %228 : vector<2x128xf32>
    %231 = arith.divf %229, %230 : vector<2x128xf32>
    %232 = vector.extract_strided_slice %225 {offsets = [0, 128], sizes = [2, 128], strides = [1, 1]} : vector<2x512xf32> to vector<2x128xf32>
    %233 = arith.negf %232 : vector<2x128xf32>
    %234 = math.exp %233 : vector<2x128xf32>
    %cst_50 = arith.constant 1.000000e+00 : f32
    %235 = vector.broadcast %cst_50 : f32 to vector<2x128xf32>
    %236 = arith.addf %235, %234 : vector<2x128xf32>
    %237 = arith.divf %235, %236 : vector<2x128xf32>
    %238 = vector.extract_strided_slice %225 {offsets = [0, 256], sizes = [2, 128], strides = [1, 1]} : vector<2x512xf32> to vector<2x128xf32>
    %239 = math.tanh %238 : vector<2x128xf32>
    %240 = vector.extract_strided_slice %225 {offsets = [0, 384], sizes = [2, 128], strides = [1, 1]} : vector<2x512xf32> to vector<2x128xf32>
    %241 = arith.negf %240 : vector<2x128xf32>
    %242 = math.exp %241 : vector<2x128xf32>
    %cst_51 = arith.constant 1.000000e+00 : f32
    %243 = vector.broadcast %cst_51 : f32 to vector<2x128xf32>
    %244 = arith.addf %243, %242 : vector<2x128xf32>
    %245 = arith.divf %243, %244 : vector<2x128xf32>
    %246 = arith.mulf %237, %223 : vector<2x128xf32>
    %247 = arith.mulf %231, %239 : vector<2x128xf32>
    %248 = arith.addf %246, %247 : vector<2x128xf32>
    %249 = math.tanh %248 : vector<2x128xf32>
    %250 = arith.mulf %245, %249 : vector<2x128xf32>
    %c7 = arith.constant 7 : index
    %c0_52 = arith.constant 0 : index
    %c0_53 = arith.constant 0 : index
    %251 = vector.load %arg0[%c7, %c0_52, %c0_53] : memref<8x2x128xf32, #tpu.memory_space<vmem>>, vector<1x2x128xf32>
    %252 = vector.shape_cast %251 : vector<1x2x128xf32> to vector<2x128xf32>
    %253 = arith.select %11, %250, %252 : vector<2x128xi1>, vector<2x128xf32>
    %254 = arith.select %11, %248, %223 : vector<2x128xi1>, vector<2x128xf32>
    %255 = arith.truncf %253 : vector<2x128xf32> to vector<2x128xbf16>
    %cst_54 = arith.constant dense<0.000000e+00> : vector<2x512xf32>
    %256 = tpu.matmul %255, %0, %cst_54 {dimension_numbers = #tpu.dot_dimension_numbers<[1], [0], [0], [1], [0, 0, 1, 1], [], []>} : vector<2x128xbf16>, vector<128x512xbf16>, vector<2x512xf32> -> vector<2x512xf32>
    %257 = vector.extract_strided_slice %256 {offsets = [0, 0], sizes = [2, 128], strides = [1, 1]} : vector<2x512xf32> to vector<2x128xf32>
    %258 = arith.negf %257 : vector<2x128xf32>
    %259 = math.exp %258 : vector<2x128xf32>
    %cst_55 = arith.constant 1.000000e+00 : f32
    %260 = vector.broadcast %cst_55 : f32 to vector<2x128xf32>
    %261 = arith.addf %260, %259 : vector<2x128xf32>
    %262 = arith.divf %260, %261 : vector<2x128xf32>
    %263 = vector.extract_strided_slice %256 {offsets = [0, 128], sizes = [2, 128], strides = [1, 1]} : vector<2x512xf32> to vector<2x128xf32>
    %264 = arith.negf %263 : vector<2x128xf32>
    %265 = math.exp %264 : vector<2x128xf32>
    %cst_56 = arith.constant 1.000000e+00 : f32
    %266 = vector.broadcast %cst_56 : f32 to vector<2x128xf32>
    %267 = arith.addf %266, %265 : vector<2x128xf32>
    %268 = arith.divf %266, %267 : vector<2x128xf32>
    %269 = vector.extract_strided_slice %256 {offsets = [0, 256], sizes = [2, 128], strides = [1, 1]} : vector<2x512xf32> to vector<2x128xf32>
    %270 = math.tanh %269 : vector<2x128xf32>
    %271 = vector.extract_strided_slice %256 {offsets = [0, 384], sizes = [2, 128], strides = [1, 1]} : vector<2x512xf32> to vector<2x128xf32>
    %272 = arith.negf %271 : vector<2x128xf32>
    %273 = math.exp %272 : vector<2x128xf32>
    %cst_57 = arith.constant 1.000000e+00 : f32
    %274 = vector.broadcast %cst_57 : f32 to vector<2x128xf32>
    %275 = arith.addf %274, %273 : vector<2x128xf32>
    %276 = arith.divf %274, %275 : vector<2x128xf32>
    %277 = arith.mulf %268, %254 : vector<2x128xf32>
    %278 = arith.mulf %262, %270 : vector<2x128xf32>
    %279 = arith.addf %277, %278 : vector<2x128xf32>
    %280 = math.tanh %279 : vector<2x128xf32>
    %281 = arith.mulf %276, %280 : vector<2x128xf32>
    %282 = arith.select %11, %281, %253 : vector<2x128xi1>, vector<2x128xf32>
    %283 = arith.select %11, %279, %254 : vector<2x128xi1>, vector<2x128xf32>
    %284 = arith.truncf %282 : vector<2x128xf32> to vector<2x128xbf16>
    %cst_58 = arith.constant dense<0.000000e+00> : vector<2x512xf32>
    %285 = tpu.matmul %284, %0, %cst_58 {dimension_numbers = #tpu.dot_dimension_numbers<[1], [0], [0], [1], [0, 0, 1, 1], [], []>} : vector<2x128xbf16>, vector<128x512xbf16>, vector<2x512xf32> -> vector<2x512xf32>
    %286 = vector.extract_strided_slice %285 {offsets = [0, 0], sizes = [2, 128], strides = [1, 1]} : vector<2x512xf32> to vector<2x128xf32>
    %287 = arith.negf %286 : vector<2x128xf32>
    %288 = math.exp %287 : vector<2x128xf32>
    %cst_59 = arith.constant 1.000000e+00 : f32
    %289 = vector.broadcast %cst_59 : f32 to vector<2x128xf32>
    %290 = arith.addf %289, %288 : vector<2x128xf32>
    %291 = arith.divf %289, %290 : vector<2x128xf32>
    %292 = vector.extract_strided_slice %285 {offsets = [0, 128], sizes = [2, 128], strides = [1, 1]} : vector<2x512xf32> to vector<2x128xf32>
    %293 = arith.negf %292 : vector<2x128xf32>
    %294 = math.exp %293 : vector<2x128xf32>
    %cst_60 = arith.constant 1.000000e+00 : f32
    %295 = vector.broadcast %cst_60 : f32 to vector<2x128xf32>
    %296 = arith.addf %295, %294 : vector<2x128xf32>
    %297 = arith.divf %295, %296 : vector<2x128xf32>
    %298 = vector.extract_strided_slice %285 {offsets = [0, 256], sizes = [2, 128], strides = [1, 1]} : vector<2x512xf32> to vector<2x128xf32>
    %299 = math.tanh %298 : vector<2x128xf32>
    %300 = vector.extract_strided_slice %285 {offsets = [0, 384], sizes = [2, 128], strides = [1, 1]} : vector<2x512xf32> to vector<2x128xf32>
    %301 = arith.negf %300 : vector<2x128xf32>
    %302 = math.exp %301 : vector<2x128xf32>
    %cst_61 = arith.constant 1.000000e+00 : f32
    %303 = vector.broadcast %cst_61 : f32 to vector<2x128xf32>
    %304 = arith.addf %303, %302 : vector<2x128xf32>
    %305 = arith.divf %303, %304 : vector<2x128xf32>
    %306 = arith.mulf %297, %283 : vector<2x128xf32>
    %307 = arith.mulf %291, %299 : vector<2x128xf32>
    %308 = arith.addf %306, %307 : vector<2x128xf32>
    %309 = math.tanh %308 : vector<2x128xf32>
    %310 = arith.mulf %305, %309 : vector<2x128xf32>
    %311 = arith.select %16, %310, %282 : vector<2x128xi1>, vector<2x128xf32>
    %312 = arith.select %16, %308, %283 : vector<2x128xi1>, vector<2x128xf32>
    %313 = arith.truncf %311 : vector<2x128xf32> to vector<2x128xbf16>
    %cst_62 = arith.constant dense<0.000000e+00> : vector<2x512xf32>
    %314 = tpu.matmul %313, %0, %cst_62 {dimension_numbers = #tpu.dot_dimension_numbers<[1], [0], [0], [1], [0, 0, 1, 1], [], []>} : vector<2x128xbf16>, vector<128x512xbf16>, vector<2x512xf32> -> vector<2x512xf32>
    %315 = vector.extract_strided_slice %314 {offsets = [0, 0], sizes = [2, 128], strides = [1, 1]} : vector<2x512xf32> to vector<2x128xf32>
    %316 = arith.negf %315 : vector<2x128xf32>
    %317 = math.exp %316 : vector<2x128xf32>
    %cst_63 = arith.constant 1.000000e+00 : f32
    %318 = vector.broadcast %cst_63 : f32 to vector<2x128xf32>
    %319 = arith.addf %318, %317 : vector<2x128xf32>
    %320 = arith.divf %318, %319 : vector<2x128xf32>
    %321 = vector.extract_strided_slice %314 {offsets = [0, 128], sizes = [2, 128], strides = [1, 1]} : vector<2x512xf32> to vector<2x128xf32>
    %322 = arith.negf %321 : vector<2x128xf32>
    %323 = math.exp %322 : vector<2x128xf32>
    %cst_64 = arith.constant 1.000000e+00 : f32
    %324 = vector.broadcast %cst_64 : f32 to vector<2x128xf32>
    %325 = arith.addf %324, %323 : vector<2x128xf32>
    %326 = arith.divf %324, %325 : vector<2x128xf32>
    %327 = vector.extract_strided_slice %314 {offsets = [0, 256], sizes = [2, 128], strides = [1, 1]} : vector<2x512xf32> to vector<2x128xf32>
    %328 = math.tanh %327 : vector<2x128xf32>
    %329 = vector.extract_strided_slice %314 {offsets = [0, 384], sizes = [2, 128], strides = [1, 1]} : vector<2x512xf32> to vector<2x128xf32>
    %330 = arith.negf %329 : vector<2x128xf32>
    %331 = math.exp %330 : vector<2x128xf32>
    %cst_65 = arith.constant 1.000000e+00 : f32
    %332 = vector.broadcast %cst_65 : f32 to vector<2x128xf32>
    %333 = arith.addf %332, %331 : vector<2x128xf32>
    %334 = arith.divf %332, %333 : vector<2x128xf32>
    %335 = arith.mulf %326, %312 : vector<2x128xf32>
    %336 = arith.mulf %320, %328 : vector<2x128xf32>
    %337 = arith.addf %335, %336 : vector<2x128xf32>
    %338 = math.tanh %337 : vector<2x128xf32>
    %339 = arith.mulf %334, %338 : vector<2x128xf32>
    %340 = arith.select %21, %339, %311 : vector<2x128xi1>, vector<2x128xf32>
    %341 = arith.select %21, %337, %312 : vector<2x128xi1>, vector<2x128xf32>
    %342 = arith.truncf %340 : vector<2x128xf32> to vector<2x128xbf16>
    %cst_66 = arith.constant dense<0.000000e+00> : vector<2x512xf32>
    %343 = tpu.matmul %342, %0, %cst_66 {dimension_numbers = #tpu.dot_dimension_numbers<[1], [0], [0], [1], [0, 0, 1, 1], [], []>} : vector<2x128xbf16>, vector<128x512xbf16>, vector<2x512xf32> -> vector<2x512xf32>
    %344 = vector.extract_strided_slice %343 {offsets = [0, 0], sizes = [2, 128], strides = [1, 1]} : vector<2x512xf32> to vector<2x128xf32>
    %345 = arith.negf %344 : vector<2x128xf32>
    %346 = math.exp %345 : vector<2x128xf32>
    %cst_67 = arith.constant 1.000000e+00 : f32
    %347 = vector.broadcast %cst_67 : f32 to vector<2x128xf32>
    %348 = arith.addf %347, %346 : vector<2x128xf32>
    %349 = arith.divf %347, %348 : vector<2x128xf32>
    %350 = vector.extract_strided_slice %343 {offsets = [0, 128], sizes = [2, 128], strides = [1, 1]} : vector<2x512xf32> to vector<2x128xf32>
    %351 = arith.negf %350 : vector<2x128xf32>
    %352 = math.exp %351 : vector<2x128xf32>
    %cst_68 = arith.constant 1.000000e+00 : f32
    %353 = vector.broadcast %cst_68 : f32 to vector<2x128xf32>
    %354 = arith.addf %353, %352 : vector<2x128xf32>
    %355 = arith.divf %353, %354 : vector<2x128xf32>
    %356 = vector.extract_strided_slice %343 {offsets = [0, 256], sizes = [2, 128], strides = [1, 1]} : vector<2x512xf32> to vector<2x128xf32>
    %357 = math.tanh %356 : vector<2x128xf32>
    %358 = vector.extract_strided_slice %343 {offsets = [0, 384], sizes = [2, 128], strides = [1, 1]} : vector<2x512xf32> to vector<2x128xf32>
    %359 = arith.negf %358 : vector<2x128xf32>
    %360 = math.exp %359 : vector<2x128xf32>
    %cst_69 = arith.constant 1.000000e+00 : f32
    %361 = vector.broadcast %cst_69 : f32 to vector<2x128xf32>
    %362 = arith.addf %361, %360 : vector<2x128xf32>
    %363 = arith.divf %361, %362 : vector<2x128xf32>
    %364 = arith.mulf %355, %341 : vector<2x128xf32>
    %365 = arith.mulf %349, %357 : vector<2x128xf32>
    %366 = arith.addf %364, %365 : vector<2x128xf32>
    %367 = math.tanh %366 : vector<2x128xf32>
    %368 = arith.mulf %363, %367 : vector<2x128xf32>
    %369 = arith.select %26, %368, %340 : vector<2x128xi1>, vector<2x128xf32>
    %370 = arith.select %26, %366, %341 : vector<2x128xi1>, vector<2x128xf32>
    %371 = arith.truncf %369 : vector<2x128xf32> to vector<2x128xbf16>
    %cst_70 = arith.constant dense<0.000000e+00> : vector<2x512xf32>
    %372 = tpu.matmul %371, %0, %cst_70 {dimension_numbers = #tpu.dot_dimension_numbers<[1], [0], [0], [1], [0, 0, 1, 1], [], []>} : vector<2x128xbf16>, vector<128x512xbf16>, vector<2x512xf32> -> vector<2x512xf32>
    %373 = vector.extract_strided_slice %372 {offsets = [0, 0], sizes = [2, 128], strides = [1, 1]} : vector<2x512xf32> to vector<2x128xf32>
    %374 = arith.negf %373 : vector<2x128xf32>
    %375 = math.exp %374 : vector<2x128xf32>
    %cst_71 = arith.constant 1.000000e+00 : f32
    %376 = vector.broadcast %cst_71 : f32 to vector<2x128xf32>
    %377 = arith.addf %376, %375 : vector<2x128xf32>
    %378 = arith.divf %376, %377 : vector<2x128xf32>
    %379 = vector.extract_strided_slice %372 {offsets = [0, 128], sizes = [2, 128], strides = [1, 1]} : vector<2x512xf32> to vector<2x128xf32>
    %380 = arith.negf %379 : vector<2x128xf32>
    %381 = math.exp %380 : vector<2x128xf32>
    %cst_72 = arith.constant 1.000000e+00 : f32
    %382 = vector.broadcast %cst_72 : f32 to vector<2x128xf32>
    %383 = arith.addf %382, %381 : vector<2x128xf32>
    %384 = arith.divf %382, %383 : vector<2x128xf32>
    %385 = vector.extract_strided_slice %372 {offsets = [0, 256], sizes = [2, 128], strides = [1, 1]} : vector<2x512xf32> to vector<2x128xf32>
    %386 = math.tanh %385 : vector<2x128xf32>
    %387 = vector.extract_strided_slice %372 {offsets = [0, 384], sizes = [2, 128], strides = [1, 1]} : vector<2x512xf32> to vector<2x128xf32>
    %388 = arith.negf %387 : vector<2x128xf32>
    %389 = math.exp %388 : vector<2x128xf32>
    %cst_73 = arith.constant 1.000000e+00 : f32
    %390 = vector.broadcast %cst_73 : f32 to vector<2x128xf32>
    %391 = arith.addf %390, %389 : vector<2x128xf32>
    %392 = arith.divf %390, %391 : vector<2x128xf32>
    %393 = arith.mulf %384, %370 : vector<2x128xf32>
    %394 = arith.mulf %378, %386 : vector<2x128xf32>
    %395 = arith.addf %393, %394 : vector<2x128xf32>
    %396 = math.tanh %395 : vector<2x128xf32>
    %397 = arith.mulf %392, %396 : vector<2x128xf32>
    %398 = arith.select %31, %397, %369 : vector<2x128xi1>, vector<2x128xf32>
    %399 = arith.select %31, %395, %370 : vector<2x128xi1>, vector<2x128xf32>
    %c0_74 = arith.constant 0 : index
    %c0_75 = arith.constant 0 : index
    %400 = vector.load %arg9[%c0_74, %c0_75] : memref<2x128xf32, #tpu.memory_space<vmem>>, vector<2x128xf32>
    tpu.vector_store %arg9[%c0_74, %c0_75], %398 {strides = array<i32>} : memref<2x128xf32, #tpu.memory_space<vmem>>, vector<2x128xf32>,
    %c0_76 = arith.constant 0 : index
    %c0_77 = arith.constant 0 : index
    %401 = vector.load %arg10[%c0_76, %c0_77] : memref<2x128xf32, #tpu.memory_space<vmem>>, vector<2x128xf32>
    tpu.vector_store %arg10[%c0_76, %c0_77], %399 {strides = array<i32>} : memref<2x128xf32, #tpu.memory_space<vmem>>, vector<2x128xf32>,
    %c0_78 = arith.constant 0 : index
    %c0_79 = arith.constant 0 : index
    %402 = vector.load %arg4[%c0_78, %c0_79] : memref<128x10xf32, #tpu.memory_space<vmem>>, vector<128x10xf32>
    %cst_80 = arith.constant dense<0.000000e+00> : vector<2x10xf32>
    %403 = tpu.matmul %398, %402, %cst_80 {dimension_numbers = #tpu.dot_dimension_numbers<[1], [0], [0], [1], [0, 0, 1, 1], [], []>} : vector<2x128xf32>, vector<128x10xf32>, vector<2x10xf32> -> vector<2x10xf32>
    %c0_81 = arith.constant 0 : index
    %c0_82 = arith.constant 0 : index
    %404 = vector.load %arg5[%c0_81, %c0_82] : memref<1x10xf32, #tpu.memory_space<vmem>>, vector<1x10xf32>
    %405 = vector.broadcast %404 : vector<1x10xf32> to vector<2x10xf32>
    %406 = arith.addf %403, %405 : vector<2x10xf32>
    %cst_83 = arith.constant 0.000000e+00 : f32
    %407 = vector.broadcast %cst_83 : f32 to vector<2x10xf32>
    %408 = arith.maximumf %406, %407 : vector<2x10xf32>
    %c0_84 = arith.constant 0 : index
    %c0_85 = arith.constant 0 : index
    %409 = vector.load %arg6[%c0_84, %c0_85] : memref<10x1xf32, #tpu.memory_space<vmem>>, vector<10x1xf32>
    %cst_86 = arith.constant dense<0.000000e+00> : vector<2x1xf32>
    %410 = tpu.matmul %408, %409, %cst_86 {dimension_numbers = #tpu.dot_dimension_numbers<[1], [0], [0], [1], [0, 0, 1, 1], [], []>} : vector<2x10xf32>, vector<10x1xf32>, vector<2x1xf32> -> vector<2x1xf32>
    %c0_87 = arith.constant 0 : index
    %c0_88 = arith.constant 0 : index
    %411 = vector.load %arg7[%c0_87, %c0_88] : memref<1x1xf32, #tpu.memory_space<vmem>>, vector<1x1xf32>
    %412 = vector.broadcast %411 : vector<1x1xf32> to vector<2x1xf32>
    %413 = arith.addf %410, %412 : vector<2x1xf32>
    %c0_89 = arith.constant 0 : index
    %c0_90 = arith.constant 0 : index
    %414 = vector.load %arg8[%c0_89, %c0_90] : memref<2x1xf32, #tpu.memory_space<vmem>>, vector<2x1xf32>
    tpu.vector_store %arg8[%c0_89, %c0_90], %413 {strides = array<i32>} : memref<2x1xf32, #tpu.memory_space<vmem>>, vector<2x1xf32>,
    return
  }
}

</mosaic_0001>

<bundles_post_ra>
// kernel: mv_lstm_forward.1
= control target key start
LH: loop header
LB: loop body
LE: loop exit
PB: predicated region body
PF: predicated region fallthrough
CT: control target
= control target key end

     0   :  { %v2213_v1 = vmov 0   ;;  %v67_v50 = vlaneseq  ;;  %vm2215_vm11 = vmmov 0   ;;  %vm1679_vm12 = vcmask 1041408   ;;  %s3231_s3 = inlined_call_operand.vmem [shape: bf16[128,512], index: 3, kind: input, shape index: {}]   ;;  %s3232_s1 = inlined_call_operand.vmem [shape: f32[2,128], index: 1, kind: input, shape index: {}]   ;;  %s3233_s2 = inlined_call_operand.vmem [shape: f32[2,128], index: 2, kind: input, shape index: {}]   ;;  %s3234_s0 = inlined_call_operand.vmem [shape: f32[8,2,128], index: 0, kind: input, shape index: {}]   ;;  %s3235_s4 = inlined_call_operand.vmem [shape: f32[128,10], index: 4, kind: input, shape index: {}]   ;;  %s3236_s6 = inlined_call_operand.vmem [shape: f32[10,1], index: 6, kind: input, shape index: {}]   ;;  %s3237_s10 = inlined_call_operand.vmem [shape: f32[2,128], index: 10, kind: output, shape index: {2}]   ;;  %s3238_s9 = inlined_call_operand.vmem [shape: f32[2,128], index: 9, kind: output, shape index: {1}]   ;;  %s3239_s7 = inlined_call_operand.<no memory space> [shape: f32[1,1], index: 7, kind: input, shape index: {}]   ;;  %s3240_s5 = inlined_call_operand.vmem [shape: f32[1,10], index: 5, kind: input, shape index: {}]   ;;  %s3241_s8 = inlined_call_operand.vmem [shape: f32[2,1], index: 8, kind: output, shape index: {0}]  }
   0x1   :  { %v2276_v0 = vld [vmem:[%s3231_s3 + $0x4] ss:$16 sps:$4 sm:$0xff]   ;;  %277 = vmatprep.mubr.bf16.mxu0 %v2213_v1  ;;  %318 = vmatprep.mubr.bf16.mxu1 %v2213_v1  ;;  %v2283_v2 = vld [vmem:[%s3231_s3] ss:$16 sps:$4 sm:$0xff]   ;;  %v2306_v6 = vld [vmem:[%s3231_s3 + $0xc] ss:$16 sps:$4 sm:$0xff]  }
   0x2   :  { %245 = vmatprep.subr.bf16.mxu0 %v2276_v0  ;;  %v2289_v3 = vld [vmem:[%s3231_s3 + $0x24] ss:$16 sps:$4 sm:$0xff]   ;;  %v2295_v4 = vld [vmem:[%s3231_s3 + $0x20] ss:$16 sps:$4 sm:$0xff]   ;;  %v2311_v7 = vld [vmem:[%s3231_s3 + $0x8] ss:$16 sps:$4 sm:$0xff]   ;;  %286 = vmatprep.subr.bf16.mxu1 %v2306_v6 }
   0x3   :  { %246 = vmatpush1.bf16.msra.mxu0 %v2283_v2  ;;  %v2301_v5 = vld [vmem:[%s3231_s3 + $0x44] ss:$16 sps:$4 sm:$0xff]   ;;  %v2317_v8 = vld [vmem:[%s3231_s3 + $0x40] ss:$16 sps:$4 sm:$0xff]   ;;  %287 = vmatpush1.bf16.msra.mxu1 %v2311_v7  ;;  %v2330_v10 = vld [vmem:[%s3231_s3 + $0x2c] ss:$16 sps:$4 sm:$0xff]  }
   0x4   :  { %247 = vmatprep.subr.bf16.mxu0 %v2289_v3  ;;  %v2324_v9 = vld [vmem:[%s3231_s3 + $0x64] ss:$16 sps:$4 sm:$0xff]   ;;  %v2335_v11 = vld [vmem:[%s3231_s3 + $0x28] ss:$16 sps:$4 sm:$0xff]   ;;  %288 = vmatprep.subr.bf16.mxu1 %v2330_v10  ;;  %v2342_v12 = vld [vmem:[%s3231_s3 + $0x60] ss:$16 sps:$4 sm:$0xff]  }
   0x5   :  { %v2347_v13 = vld [vmem:[%s3231_s3 + $0x84] ss:$16 sps:$4 sm:$0xff]   ;;  %v2352_v14 = vld [vmem:[%s3231_s3 + $0x4c] ss:$16 sps:$4 sm:$0xff]   ;;  %v2359_v15 = vld [vmem:[%s3231_s3 + $0x48] ss:$16 sps:$4 sm:$0xff]  }
   0x6   :  { %v2365_v16 = vld [vmem:[%s3231_s3 + $0x6c] ss:$16 sps:$4 sm:$0xff]   ;;  %v2371_v17 = vld [vmem:[%s3231_s3 + $0x80] ss:$16 sps:$4 sm:$0xff]   ;;  %v2377_v18 = vld [vmem:[%s3231_s3 + $0xa4] ss:$16 sps:$4 sm:$0xff]  }
   0x7   :  { %248 = vmatpush1.bf16.msra.mxu0 %v2295_v4  ;;  %289 = vmatpush1.bf16.msra.mxu1 %v2335_v11  ;;  %v2383_v19 = vld [vmem:[%s3231_s3 + $0x68] ss:$16 sps:$4 sm:$0xff]   ;;  %v2389_v20 = vld [vmem:[%s3231_s3 + $0x8c] ss:$16 sps:$4 sm:$0xff]   ;;  %v2395_v21 = vld [vmem:[%s3231_s3 + $0xa0] ss:$16 sps:$4 sm:$0xff]  }
   0x8   :  { %249 = vmatprep.subr.bf16.mxu0 %v2301_v5  ;;  %290 = vmatprep.subr.bf16.mxu1 %v2352_v14  ;;  %v2401_v22 = vld [vmem:[%s3231_s3 + $0xc4] ss:$16 sps:$4 sm:$0xff]   ;;  %v2407_v23 = vld [vmem:[%s3231_s3 + $0x88] ss:$16 sps:$4 sm:$0xff]   ;;  %v2413_v24 = vld [vmem:[%s3231_s3 + $0xac] ss:$16 sps:$4 sm:$0xff]  }
   0x9   :  { %v2419_v25 = vld [vmem:[%s3231_s3 + $0xc0] ss:$16 sps:$4 sm:$0xff]   ;;  %v2425_v26 = vld [vmem:[%s3231_s3 + $0xe4] ss:$16 sps:$4 sm:$0xff]   ;;  %v2431_v27 = vld [vmem:[%s3231_s3 + $0xa8] ss:$16 sps:$4 sm:$0xff]  }
   0xa   :  { %v2437_v28 = vld [vmem:[%s3231_s3 + $0xcc] ss:$16 sps:$4 sm:$0xff]   ;;  %v2443_v29 = vld [vmem:[%s3231_s3 + $0xe0] ss:$16 sps:$4 sm:$0xff]   ;;  %v2455_v31 = vld [vmem:[%s3231_s3 + $0xc8] ss:$16 sps:$4 sm:$0xff]  }
   0xb   :  { %250 = vmatpush1.bf16.msra.mxu0 %v2317_v8  ;;  %291 = vmatpush1.bf16.msra.mxu1 %v2359_v15  ;;  %v2448_v30 = vld [vmem:[%s3232_s1] sm:$0x3]  ;;  %v2461_v32 = vld [vmem:[%s3231_s3 + $0xec] ss:$16 sps:$4 sm:$0xff]   ;;  %v2470_v34 = vld [vmem:[%s3231_s3 + $0xe8] ss:$16 sps:$4 sm:$0xff]  }
   0xc   :  { %251 = vmatprep.subr.bf16.mxu0 %v2324_v9  ;;  %292 = vmatprep.subr.bf16.mxu1 %v2365_v16  ;;  %v84_v33 = vpack.c.bf16 %v2448_v30, %v2448_v30  ;;  %v2510_v53 = vand.u32 127, %v67_v50  ;;  %v83_v54 = vld [vmem:[%s3233_s2] sm:$0x3]  ;;  %v1802_v62 = vld [vmem:[%s3234_s0 + $0x2] sm:$0x3]  ;;  %vm2217_vm13 = vmmov 1  }
   0xd   :  { %vm1934_vm14 = vmpackc.low %vm1679_vm12, %vm2217_vm13 }
   0xe   :  { %vm69_vm0 = vcmp.lt.s32.totalorder %v2510_v53, 15  ;;  %vm73_vm1 = vcmp.lt.s32.totalorder %v2510_v53, 75  ;;  %vm70_vm2 = vcmp.lt.s32.totalorder %v2510_v53, 30  ;;  %vm71_vm3 = vcmp.lt.s32.totalorder %v2510_v53, 45 }
   0xf   :  { %252 = vmatpush1.bf16.msra.mxu0 %v2342_v12  ;;  %293 = vmatpush1.bf16.msra.mxu1 %v2383_v19  ;;  %vm72_vm4 = vcmp.lt.s32.totalorder %v2510_v53, 60  ;;  %vm74_vm5 = vcmp.ge.s32.totalorder %v2510_v53, 15  ;;  %vm76_vm7 = vcmp.ge.s32.totalorder %v2510_v53, 30  ;;  %vm78_vm9 = vcmp.ge.s32.totalorder %v2510_v53, 45 }
  0x10   :  { %253 = vmatprep.subr.bf16.mxu0 %v2347_v13  ;;  %294 = vmatprep.subr.bf16.mxu1 %v2389_v20  ;;  %vm75_vm6 = vmand %vm73_vm1, %vm74_vm5  ;;  %vm80_vm15 = vcmp.ge.s32.totalorder %v2510_v53, 60  ;;  %v16_v53 = vstv %s3239_s7 }
  0x11   :  { %vm77_vm8 = vmand %vm73_vm1, %vm76_vm7  ;;  %17 = vst [vmem:[#allocation2] sm:$0x1] %v16_v53 }
  0x12   :  { %vm79_vm10 = vmand %vm73_vm1, %vm78_vm9 }
  0x13   :  { %254 = vmatpush1.bf16.msra.mxu0 %v2371_v17  ;;  %295 = vmatpush1.bf16.msra.mxu1 %v2407_v23 }
  0x14   :  { %255 = vmatprep.subr.bf16.mxu0 %v2377_v18  ;;  %296 = vmatprep.subr.bf16.mxu1 %v2413_v24 }
  0x17   :  { %256 = vmatpush1.bf16.msra.mxu0 %v2395_v21  ;;  %297 = vmatpush1.bf16.msra.mxu1 %v2431_v27 }
  0x18   :  { %257 = vmatprep.subr.bf16.mxu0 %v2401_v22  ;;  %298 = vmatprep.subr.bf16.mxu1 %v2437_v28 }
  0x1b   :  { %258 = vmatpush1.bf16.msra.mxu0 %v2419_v25  ;;  %299 = vmatpush1.bf16.msra.mxu1 %v2455_v31 }
  0x1c   :  { %259 = vmatprep.subr.bf16.mxu0 %v2425_v26  ;;  %300 = vmatprep.subr.bf16.mxu1 %v2461_v32 }
  0x1f   :  { %260 = vmatpush1.bf16.msra.mxu0 %v2443_v29  ;;  %301 = vmatpush1.bf16.msra.mxu1 %v2470_v34 }
  0x20   :  { %357 = vmatprep.subr.bf16.mxu0 %v2276_v0  ;;  %398 = vmatprep.subr.bf16.mxu1 %v2306_v6 }
  0x22   :  { %278 = vmatmul.mubr.bf16.vlgmr.msra.gmra.mrb[0].mxu0 %v84_v33  ;;  %319 = vmatmul.mubr.bf16.vlgmr.msra.gmra.mrb[0].mxu1 %v84_v33 }
  0x23   :  { %358 = vmatpush1.bf16.msra.mxu0 %v2283_v2  ;;  %389 = vmatprep.mubr.bf16.mxu0 %v2213_v1 }
  0x24   :  { %359 = vmatprep.subr.bf16.mxu0 %v2289_v3  ;;  %399 = vmatpush1.bf16.msra.mxu1 %v2311_v7 }
  0x25   :  { %400 = vmatprep.subr.bf16.mxu1 %v2330_v10  ;;  %430 = vmatprep.mubr.bf16.mxu1 %v2213_v1 }
  0x27   :  { %360 = vmatpush1.bf16.msra.mxu0 %v2295_v4 }
  0x28   :  { %361 = vmatprep.subr.bf16.mxu0 %v2301_v5  ;;  %401 = vmatpush1.bf16.msra.mxu1 %v2335_v11 }
  0x29   :  { %402 = vmatprep.subr.bf16.mxu1 %v2352_v14 }
  0x2b   :  { %362 = vmatpush1.bf16.msra.mxu0 %v2317_v8 }
  0x2c   :  { %363 = vmatprep.subr.bf16.mxu0 %v2324_v9  ;;  %403 = vmatpush1.bf16.msra.mxu1 %v2359_v15 }
  0x2d   :  { %404 = vmatprep.subr.bf16.mxu1 %v2365_v16 }
  0x2f   :  { %364 = vmatpush1.bf16.msra.mxu0 %v2342_v12 }
  0x30   :  { %365 = vmatprep.subr.bf16.mxu0 %v2347_v13  ;;  %405 = vmatpush1.bf16.msra.mxu1 %v2383_v19 }
  0x31   :  { %406 = vmatprep.subr.bf16.mxu1 %v2389_v20 }
  0x33   :  { %366 = vmatpush1.bf16.msra.mxu0 %v2371_v17 }
  0x34   :  { %367 = vmatprep.subr.bf16.mxu0 %v2377_v18  ;;  %407 = vmatpush1.bf16.msra.mxu1 %v2407_v23 }
  0x35   :  { %408 = vmatprep.subr.bf16.mxu1 %v2413_v24 }
  0x37   :  { %368 = vmatpush1.bf16.msra.mxu0 %v2395_v21 }
  0x38   :  { %369 = vmatprep.subr.bf16.mxu0 %v2401_v22  ;;  %409 = vmatpush1.bf16.msra.mxu1 %v2431_v27 }
  0x39   :  { %410 = vmatprep.subr.bf16.mxu1 %v2437_v28 }
  0x3b   :  { %370 = vmatpush1.bf16.msra.mxu0 %v2419_v25 }
  0x3c   :  { %371 = vmatprep.subr.bf16.mxu0 %v2425_v26  ;;  %411 = vmatpush1.bf16.msra.mxu1 %v2455_v31 }
  0x3d   :  { %412 = vmatprep.subr.bf16.mxu1 %v2461_v32 }
  0x3f   :  { %372 = vmatpush1.bf16.msra.mxu0 %v2443_v29 }
  0x40   :  { %469 = vmatprep.subr.bf16.mxu0 %v2276_v0  ;;  %413 = vmatpush1.bf16.msra.mxu1 %v2470_v34 }
  0x41   :  { %510 = vmatprep.subr.bf16.mxu1 %v2306_v6 }
  0xf5   :  { %v279_v35 = vpop.f32.mrb[0].mxu0  ;;  %v320_v41 = vpop.f32.mrb[0].mxu1 }
  0xf6   :  { %v1799_v36 = vmul.f32 -1.442695, %v279_v35  ;;  %v281_v37 = vpop.f32.mrb[1].mxu0  ;;  %v322_v42 = vpop.f32.mrb[1].mxu1  ;;  %v353_v35 = vsel %vm73_vm1, %v2448_v30, %v1802_v62 }
  0xf7   :  { %v1800_v38 = vmul.f32 -1.442695, %v281_v37  ;;  %v283_v39 = vpop.f32.mrb[2].mxu0  ;;  %v324_v43 = vpop.f32.mrb[2].mxu1  ;;  %v1801_v45 = vmul.f32 -1.442695, %v322_v42 }
  0xf8   :  { %1989 = vpow2.f32 %v1799_v36  ;;  %v284_v40 = vpop.f32.mrb[3].mxu0  ;;  %v325_v44 = vpop.f32.mrb[3].mxu1 }
  0xf9   :  { %1991 = vpow2.f32 %v1800_v38 }
  0xfa   :  { %1993 = vpow2.f32 %v1801_v45 }
  0xfb   :  { %1995 = vtanh.f32 %v320_v41 }
 0x102   :  { %v1990_v46 = vpop.eup %1989 }
 0x103   :  { %v1992_v47 = vpop.eup %1991  ;;  %v330_v48 = vadd.f32 1.0, %v1990_v46 }
 0x104   :  { %v336_v49 = vadd.f32 1.0, %v1992_v47  ;;  %v1994_v51 = vpop.eup %1993 }
 0x105   :  { %1997 = vrcp.f32 %v330_v48  ;;  %v1996_v52 = vpop.eup %1995  ;;  %v343_v56 = vadd.f32 1.0, %v1994_v51 }
 0x106   :  { %1999 = vrcp.f32 %v336_v49 }
 0x107   :  { %2001 = vrcp.f32 %v343_v56 }
 0x10f   :  { %v1998_v55 = vpop.eup %1997 }
 0x110   :  { %v2000_v57 = vpop.eup %1999  ;;  %v347_v58 = vmul.f32 %v1998_v55, %v1996_v52 }
 0x111   :  { %v346_v59 = vmul.f32 %v2000_v57, %v83_v54  ;;  %v2002_v63 = vpop.eup %2001 }
 0x113   :  { %v348_v60 = vadd.f32 %v347_v58, %v346_v59 }
 0x115   :  { %2003 = vtanh.f32 %v348_v60  ;;  %v2516_v61 = vsel %vm69_vm0, %v348_v60, %v83_v54 }
 0x11f   :  { %v2004_v33 = vpop.eup %2003 }
 0x120   :  { %v350_v36 = vmul.f32 %v2004_v33, %v2002_v63 }
 0x122   :  { %v2525_v37 = vsel %vm69_vm0, %v350_v36, %v353_v35  ;;  %v1806_v35 = vld [vmem:[%s3234_s0 + $0x4] sm:$0x3]  ;;  %vm81_vm0 = vmand %vm73_vm1, %vm80_vm15 }
 0x123   :  { %v356_v38 = vpack.c.bf16 %v2525_v37, %v2525_v37 }
 0x125   :  { %390 = vmatmul.mubr.bf16.vlgmr.msra.gmra.mrb[4].mxu0 %v356_v38  ;;  %431 = vmatmul.mubr.bf16.vlgmr.msra.gmra.mrb[4].mxu1 %v356_v38 }
 0x126   :  { %470 = vmatpush1.bf16.msra.mxu0 %v2283_v2  ;;  %511 = vmatpush1.bf16.msra.mxu1 %v2311_v7 }
 0x127   :  { %471 = vmatprep.subr.bf16.mxu0 %v2289_v3  ;;  %512 = vmatprep.subr.bf16.mxu1 %v2330_v10 }
 0x128   :  { %501 = vmatprep.mubr.bf16.mxu0 %v2213_v1  ;;  %542 = vmatprep.mubr.bf16.mxu1 %v2213_v1 }
 0x12a   :  { %472 = vmatpush1.bf16.msra.mxu0 %v2295_v4  ;;  %513 = vmatpush1.bf16.msra.mxu1 %v2335_v11 }
 0x12b   :  { %473 = vmatprep.subr.bf16.mxu0 %v2301_v5  ;;  %514 = vmatprep.subr.bf16.mxu1 %v2352_v14 }
 0x12e   :  { %474 = vmatpush1.bf16.msra.mxu0 %v2317_v8  ;;  %515 = vmatpush1.bf16.msra.mxu1 %v2359_v15 }
 0x12f   :  { %475 = vmatprep.subr.bf16.mxu0 %v2324_v9  ;;  %516 = vmatprep.subr.bf16.mxu1 %v2365_v16 }
 0x132   :  { %476 = vmatpush1.bf16.msra.mxu0 %v2342_v12  ;;  %517 = vmatpush1.bf16.msra.mxu1 %v2383_v19 }
 0x133   :  { %477 = vmatprep.subr.bf16.mxu0 %v2347_v13  ;;  %518 = vmatprep.subr.bf16.mxu1 %v2389_v20 }
 0x136   :  { %478 = vmatpush1.bf16.msra.mxu0 %v2371_v17  ;;  %519 = vmatpush1.bf16.msra.mxu1 %v2407_v23 }
 0x137   :  { %479 = vmatprep.subr.bf16.mxu0 %v2377_v18  ;;  %520 = vmatprep.subr.bf16.mxu1 %v2413_v24 }
 0x13a   :  { %480 = vmatpush1.bf16.msra.mxu0 %v2395_v21  ;;  %521 = vmatpush1.bf16.msra.mxu1 %v2431_v27 }
 0x13b   :  { %481 = vmatprep.subr.bf16.mxu0 %v2401_v22  ;;  %522 = vmatprep.subr.bf16.mxu1 %v2437_v28 }
 0x13e   :  { %482 = vmatpush1.bf16.msra.mxu0 %v2419_v25  ;;  %523 = vmatpush1.bf16.msra.mxu1 %v2455_v31 }
 0x13f   :  { %483 = vmatprep.subr.bf16.mxu0 %v2425_v26  ;;  %524 = vmatprep.subr.bf16.mxu1 %v2461_v32 }
 0x142   :  { %484 = vmatpush1.bf16.msra.mxu0 %v2443_v29  ;;  %525 = vmatpush1.bf16.msra.mxu1 %v2470_v34 }
 0x143   :  { %581 = vmatprep.subr.bf16.mxu0 %v2276_v0  ;;  %622 = vmatprep.subr.bf16.mxu1 %v2306_v6 }
 0x1f8   :  { %v391_v30 = vpop.f32.mrb[4].mxu0  ;;  %v432_v39 = vpop.f32.mrb[4].mxu1 }
 0x1f9   :  { %v1803_v40 = vmul.f32 -1.442695, %v391_v30  ;;  %v393_v41 = vpop.f32.mrb[5].mxu0  ;;  %v434_v42 = vpop.f32.mrb[5].mxu1  ;;  %v465_v30 = vsel %vm73_vm1, %v2525_v37, %v1806_v35 }
 0x1fa   :  { %v1804_v43 = vmul.f32 -1.442695, %v393_v41  ;;  %v395_v44 = vpop.f32.mrb[6].mxu0  ;;  %v436_v45 = vpop.f32.mrb[6].mxu1  ;;  %v1805_v48 = vmul.f32 -1.442695, %v434_v42 }
 0x1fb   :  { %2005 = vpow2.f32 %v1803_v40  ;;  %v396_v46 = vpop.f32.mrb[7].mxu0  ;;  %v437_v47 = vpop.f32.mrb[7].mxu1 }
 0x1fc   :  { %2007 = vpow2.f32 %v1804_v43 }
 0x1fd   :  { %2009 = vpow2.f32 %v1805_v48 }
 0x1fe   :  { %2011 = vtanh.f32 %v432_v39 }
 0x205   :  { %v2006_v49 = vpop.eup %2005 }
 0x206   :  { %v2008_v50 = vpop.eup %2007  ;;  %v442_v51 = vadd.f32 1.0, %v2006_v49 }
 0x207   :  { %v448_v52 = vadd.f32 1.0, %v2008_v50  ;;  %v2010_v54 = vpop.eup %2009 }
 0x208   :  { %2013 = vrcp.f32 %v442_v51  ;;  %v2012_v55 = vpop.eup %2011  ;;  %v455_v59 = vadd.f32 1.0, %v2010_v54 }
 0x209   :  { %2015 = vrcp.f32 %v448_v52 }
 0x20a   :  { %2017 = vrcp.f32 %v455_v59 }
 0x212   :  { %v2014_v56 = vpop.eup %2013 }
 0x213   :  { %v2016_v57 = vpop.eup %2015  ;;  %v459_v58 = vmul.f32 %v2014_v56, %v2012_v55 }
 0x214   :  { %v458_v60 = vmul.f32 %v2016_v57, %v2516_v61  ;;  %v2018_v33 = vpop.eup %2017 }
 0x216   :  { %v460_v62 = vadd.f32 %v459_v58, %v458_v60 }
 0x218   :  { %2019 = vtanh.f32 %v460_v62  ;;  %v2566_v63 = vsel %vm70_vm2, %v460_v62, %v2516_v61 }
 0x222   :  { %v2020_v36 = vpop.eup %2019 }
 0x223   :  { %v462_v38 = vmul.f32 %v2020_v36, %v2018_v33 }
 0x225   :  { %v2574_v39 = vsel %vm70_vm2, %v462_v38, %v465_v30  ;;  %v1810_v38 = vld [vmem:[%s3234_s0 + $0x6] sm:$0x3]  ;;  %vm1753_vm2 = vcmask 1024  }
 0x226   :  { %v468_v40 = vpack.c.bf16 %v2574_v39, %v2574_v39 }
 0x228   :  { %502 = vmatmul.mubr.bf16.vlgmr.msra.gmra.mrb[8].mxu0 %v468_v40  ;;  %543 = vmatmul.mubr.bf16.vlgmr.msra.gmra.mrb[8].mxu1 %v468_v40 }
 0x229   :  { %582 = vmatpush1.bf16.msra.mxu0 %v2283_v2  ;;  %623 = vmatpush1.bf16.msra.mxu1 %v2311_v7 }
 0x22a   :  { %583 = vmatprep.subr.bf16.mxu0 %v2289_v3  ;;  %624 = vmatprep.subr.bf16.mxu1 %v2330_v10 }
 0x22b   :  { %613 = vmatprep.mubr.bf16.mxu0 %v2213_v1  ;;  %654 = vmatprep.mubr.bf16.mxu1 %v2213_v1 }
 0x22d   :  { %584 = vmatpush1.bf16.msra.mxu0 %v2295_v4  ;;  %625 = vmatpush1.bf16.msra.mxu1 %v2335_v11 }
 0x22e   :  { %585 = vmatprep.subr.bf16.mxu0 %v2301_v5  ;;  %626 = vmatprep.subr.bf16.mxu1 %v2352_v14 }
 0x231   :  { %586 = vmatpush1.bf16.msra.mxu0 %v2317_v8  ;;  %627 = vmatpush1.bf16.msra.mxu1 %v2359_v15 }
 0x232   :  { %587 = vmatprep.subr.bf16.mxu0 %v2324_v9  ;;  %628 = vmatprep.subr.bf16.mxu1 %v2365_v16 }
 0x235   :  { %588 = vmatpush1.bf16.msra.mxu0 %v2342_v12  ;;  %629 = vmatpush1.bf16.msra.mxu1 %v2383_v19 }
 0x236   :  { %589 = vmatprep.subr.bf16.mxu0 %v2347_v13  ;;  %630 = vmatprep.subr.bf16.mxu1 %v2389_v20 }
 0x239   :  { %590 = vmatpush1.bf16.msra.mxu0 %v2371_v17  ;;  %631 = vmatpush1.bf16.msra.mxu1 %v2407_v23 }
 0x23a   :  { %591 = vmatprep.subr.bf16.mxu0 %v2377_v18  ;;  %632 = vmatprep.subr.bf16.mxu1 %v2413_v24 }
 0x23d   :  { %592 = vmatpush1.bf16.msra.mxu0 %v2395_v21  ;;  %633 = vmatpush1.bf16.msra.mxu1 %v2431_v27 }
 0x23e   :  { %593 = vmatprep.subr.bf16.mxu0 %v2401_v22  ;;  %634 = vmatprep.subr.bf16.mxu1 %v2437_v28 }
 0x241   :  { %594 = vmatpush1.bf16.msra.mxu0 %v2419_v25  ;;  %635 = vmatpush1.bf16.msra.mxu1 %v2455_v31 }
 0x242   :  { %595 = vmatprep.subr.bf16.mxu0 %v2425_v26  ;;  %636 = vmatprep.subr.bf16.mxu1 %v2461_v32 }
 0x245   :  { %596 = vmatpush1.bf16.msra.mxu0 %v2443_v29  ;;  %637 = vmatpush1.bf16.msra.mxu1 %v2470_v34 }
 0x246   :  { %693 = vmatprep.subr.bf16.mxu0 %v2276_v0  ;;  %734 = vmatprep.subr.bf16.mxu1 %v2306_v6 }
 0x2fb   :  { %v503_v61 = vpop.f32.mrb[8].mxu0  ;;  %v544_v37 = vpop.f32.mrb[8].mxu1 }
 0x2fc   :  { %v1807_v41 = vmul.f32 -1.442695, %v503_v61  ;;  %v505_v42 = vpop.f32.mrb[9].mxu0  ;;  %v546_v43 = vpop.f32.mrb[9].mxu1  ;;  %v577_v61 = vsel %vm73_vm1, %v2574_v39, %v1810_v38 }
 0x2fd   :  { %v1808_v44 = vmul.f32 -1.442695, %v505_v42  ;;  %v507_v45 = vpop.f32.mrb[10].mxu0  ;;  %v548_v46 = vpop.f32.mrb[10].mxu1  ;;  %v1809_v49 = vmul.f32 -1.442695, %v546_v43 }
 0x2fe   :  { %2021 = vpow2.f32 %v1807_v41  ;;  %v508_v47 = vpop.f32.mrb[11].mxu0  ;;  %v549_v48 = vpop.f32.mrb[11].mxu1 }
 0x2ff   :  { %2023 = vpow2.f32 %v1808_v44 }
 0x300   :  { %2025 = vpow2.f32 %v1809_v49 }
 0x301   :  { %2027 = vtanh.f32 %v544_v37 }
 0x308   :  { %v2022_v50 = vpop.eup %2021 }
 0x309   :  { %v2024_v51 = vpop.eup %2023  ;;  %v554_v52 = vadd.f32 1.0, %v2022_v50 }
 0x30a   :  { %v560_v54 = vadd.f32 1.0, %v2024_v51  ;;  %v2026_v55 = vpop.eup %2025 }
 0x30b   :  { %2029 = vrcp.f32 %v554_v52  ;;  %v2028_v56 = vpop.eup %2027  ;;  %v567_v60 = vadd.f32 1.0, %v2026_v55 }
 0x30c   :  { %2031 = vrcp.f32 %v560_v54 }
 0x30d   :  { %2033 = vrcp.f32 %v567_v60 }
 0x315   :  { %v2030_v57 = vpop.eup %2029 }
 0x316   :  { %v2032_v58 = vpop.eup %2031  ;;  %v571_v59 = vmul.f32 %v2030_v57, %v2028_v56 }
 0x317   :  { %v570_v62 = vmul.f32 %v2032_v58, %v2566_v63  ;;  %v2034_v36 = vpop.eup %2033 }
 0x319   :  { %v572_v33 = vadd.f32 %v571_v59, %v570_v62 }
 0x31b   :  { %2035 = vtanh.f32 %v572_v33  ;;  %v2615_v35 = vsel %vm71_vm3, %v572_v33, %v2566_v63 }
 0x325   :  { %v2036_v30 = vpop.eup %2035 }
 0x326   :  { %v574_v40 = vmul.f32 %v2036_v30, %v2034_v36 }
 0x328   :  { %v2623_v37 = vsel %vm71_vm3, %v574_v40, %v577_v61  ;;  %v1814_v40 = vld [vmem:[%s3234_s0 + $0x8] sm:$0x3] }
 0x329   :  { %v580_v41 = vpack.c.bf16 %v2623_v37, %v2623_v37 }
 0x32b   :  { %614 = vmatmul.mubr.bf16.vlgmr.msra.gmra.mrb[12].mxu0 %v580_v41  ;;  %655 = vmatmul.mubr.bf16.vlgmr.msra.gmra.mrb[12].mxu1 %v580_v41 }
 0x32c   :  { %694 = vmatpush1.bf16.msra.mxu0 %v2283_v2  ;;  %735 = vmatpush1.bf16.msra.mxu1 %v2311_v7 }
 0x32d   :  { %695 = vmatprep.subr.bf16.mxu0 %v2289_v3  ;;  %736 = vmatprep.subr.bf16.mxu1 %v2330_v10 }
 0x32e   :  { %725 = vmatprep.mubr.bf16.mxu0 %v2213_v1  ;;  %766 = vmatprep.mubr.bf16.mxu1 %v2213_v1 }
 0x330   :  { %696 = vmatpush1.bf16.msra.mxu0 %v2295_v4  ;;  %737 = vmatpush1.bf16.msra.mxu1 %v2335_v11 }
 0x331   :  { %697 = vmatprep.subr.bf16.mxu0 %v2301_v5  ;;  %738 = vmatprep.subr.bf16.mxu1 %v2352_v14 }
 0x334   :  { %698 = vmatpush1.bf16.msra.mxu0 %v2317_v8  ;;  %739 = vmatpush1.bf16.msra.mxu1 %v2359_v15 }
 0x335   :  { %699 = vmatprep.subr.bf16.mxu0 %v2324_v9  ;;  %740 = vmatprep.subr.bf16.mxu1 %v2365_v16 }
 0x338   :  { %700 = vmatpush1.bf16.msra.mxu0 %v2342_v12  ;;  %741 = vmatpush1.bf16.msra.mxu1 %v2383_v19 }
 0x339   :  { %701 = vmatprep.subr.bf16.mxu0 %v2347_v13  ;;  %742 = vmatprep.subr.bf16.mxu1 %v2389_v20 }
 0x33c   :  { %702 = vmatpush1.bf16.msra.mxu0 %v2371_v17  ;;  %743 = vmatpush1.bf16.msra.mxu1 %v2407_v23 }
 0x33d   :  { %703 = vmatprep.subr.bf16.mxu0 %v2377_v18  ;;  %744 = vmatprep.subr.bf16.mxu1 %v2413_v24 }
 0x340   :  { %704 = vmatpush1.bf16.msra.mxu0 %v2395_v21  ;;  %745 = vmatpush1.bf16.msra.mxu1 %v2431_v27 }
 0x341   :  { %705 = vmatprep.subr.bf16.mxu0 %v2401_v22  ;;  %746 = vmatprep.subr.bf16.mxu1 %v2437_v28 }
 0x344   :  { %706 = vmatpush1.bf16.msra.mxu0 %v2419_v25  ;;  %747 = vmatpush1.bf16.msra.mxu1 %v2455_v31 }
 0x345   :  { %707 = vmatprep.subr.bf16.mxu0 %v2425_v26  ;;  %748 = vmatprep.subr.bf16.mxu1 %v2461_v32 }
 0x348   :  { %708 = vmatpush1.bf16.msra.mxu0 %v2443_v29  ;;  %749 = vmatpush1.bf16.msra.mxu1 %v2470_v34 }
 0x349   :  { %804 = vmatprep.subr.bf16.mxu0 %v2276_v0  ;;  %845 = vmatprep.subr.bf16.mxu1 %v2306_v6 }
 0x3fe   :  { %v615_v63 = vpop.f32.mrb[12].mxu0  ;;  %v656_v39 = vpop.f32.mrb[12].mxu1 }
 0x3ff   :  { %v1811_v42 = vmul.f32 -1.442695, %v615_v63  ;;  %v617_v43 = vpop.f32.mrb[13].mxu0  ;;  %v658_v44 = vpop.f32.mrb[13].mxu1  ;;  %v689_v63 = vsel %vm73_vm1, %v2623_v37, %v1814_v40 }
 0x400   :  { %v1812_v45 = vmul.f32 -1.442695, %v617_v43  ;;  %v619_v46 = vpop.f32.mrb[14].mxu0  ;;  %v660_v47 = vpop.f32.mrb[14].mxu1  ;;  %v1813_v50 = vmul.f32 -1.442695, %v658_v44 }
 0x401   :  { %2037 = vpow2.f32 %v1811_v42  ;;  %v620_v48 = vpop.f32.mrb[15].mxu0  ;;  %v661_v49 = vpop.f32.mrb[15].mxu1 }
 0x402   :  { %2039 = vpow2.f32 %v1812_v45 }
 0x403   :  { %2041 = vpow2.f32 %v1813_v50 }
 0x404   :  { %2043 = vtanh.f32 %v656_v39 }
 0x40b   :  { %v2038_v51 = vpop.eup %2037 }
 0x40c   :  { %v2040_v52 = vpop.eup %2039  ;;  %v666_v54 = vadd.f32 1.0, %v2038_v51 }
 0x40d   :  { %v672_v55 = vadd.f32 1.0, %v2040_v52  ;;  %v2042_v56 = vpop.eup %2041 }
 0x40e   :  { %2045 = vrcp.f32 %v666_v54  ;;  %v2044_v57 = vpop.eup %2043  ;;  %v679_v62 = vadd.f32 1.0, %v2042_v56 }
 0x40f   :  { %2047 = vrcp.f32 %v672_v55 }
 0x410   :  { %2049 = vrcp.f32 %v679_v62 }
 0x418   :  { %v2046_v58 = vpop.eup %2045 }
 0x419   :  { %v2048_v59 = vpop.eup %2047  ;;  %v683_v60 = vmul.f32 %v2046_v58, %v2044_v57 }
 0x41a   :  { %v682_v33 = vmul.f32 %v2048_v59, %v2615_v35  ;;  %v2050_v30 = vpop.eup %2049 }
 0x41c   :  { %v684_v36 = vadd.f32 %v683_v60, %v682_v33 }
 0x41e   :  { %2051 = vtanh.f32 %v684_v36  ;;  %v2664_v38 = vsel %vm72_vm4, %v684_v36, %v2615_v35 }
 0x428   :  { %v2052_v61 = vpop.eup %2051 }
 0x429   :  { %v686_v41 = vmul.f32 %v2052_v61, %v2050_v30  ;;  %v1818_v61 = vld [vmem:[%s3234_s0 + $0xa] sm:$0x3] }
 0x42b   :  { %v690_v39 = vsel %vm72_vm4, %v686_v41, %v689_v63 }
 0x42c   :  { %v692_v42 = vpack.c.bf16 %v690_v39, %v690_v39 }
 0x42e   :  { %726 = vmatmul.mubr.bf16.vlgmr.msra.gmra.mrb[16].mxu0 %v692_v42  ;;  %767 = vmatmul.mubr.bf16.vlgmr.msra.gmra.mrb[16].mxu1 %v692_v42 }
 0x42f   :  { %805 = vmatpush1.bf16.msra.mxu0 %v2283_v2  ;;  %846 = vmatpush1.bf16.msra.mxu1 %v2311_v7 }
 0x430   :  { %806 = vmatprep.subr.bf16.mxu0 %v2289_v3  ;;  %847 = vmatprep.subr.bf16.mxu1 %v2330_v10 }
 0x431   :  { %836 = vmatprep.mubr.bf16.mxu0 %v2213_v1  ;;  %877 = vmatprep.mubr.bf16.mxu1 %v2213_v1 }
 0x433   :  { %807 = vmatpush1.bf16.msra.mxu0 %v2295_v4  ;;  %848 = vmatpush1.bf16.msra.mxu1 %v2335_v11 }
 0x434   :  { %808 = vmatprep.subr.bf16.mxu0 %v2301_v5  ;;  %849 = vmatprep.subr.bf16.mxu1 %v2352_v14 }
 0x437   :  { %809 = vmatpush1.bf16.msra.mxu0 %v2317_v8  ;;  %850 = vmatpush1.bf16.msra.mxu1 %v2359_v15 }
 0x438   :  { %810 = vmatprep.subr.bf16.mxu0 %v2324_v9  ;;  %851 = vmatprep.subr.bf16.mxu1 %v2365_v16 }
 0x43b   :  { %811 = vmatpush1.bf16.msra.mxu0 %v2342_v12  ;;  %852 = vmatpush1.bf16.msra.mxu1 %v2383_v19 }
 0x43c   :  { %812 = vmatprep.subr.bf16.mxu0 %v2347_v13  ;;  %853 = vmatprep.subr.bf16.mxu1 %v2389_v20 }
 0x43f   :  { %813 = vmatpush1.bf16.msra.mxu0 %v2371_v17  ;;  %854 = vmatpush1.bf16.msra.mxu1 %v2407_v23 }
 0x440   :  { %814 = vmatprep.subr.bf16.mxu0 %v2377_v18  ;;  %855 = vmatprep.subr.bf16.mxu1 %v2413_v24 }
 0x443   :  { %815 = vmatpush1.bf16.msra.mxu0 %v2395_v21  ;;  %856 = vmatpush1.bf16.msra.mxu1 %v2431_v27 }
 0x444   :  { %816 = vmatprep.subr.bf16.mxu0 %v2401_v22  ;;  %857 = vmatprep.subr.bf16.mxu1 %v2437_v28 }
 0x447   :  { %817 = vmatpush1.bf16.msra.mxu0 %v2419_v25  ;;  %858 = vmatpush1.bf16.msra.mxu1 %v2455_v31 }
 0x448   :  { %818 = vmatprep.subr.bf16.mxu0 %v2425_v26  ;;  %859 = vmatprep.subr.bf16.mxu1 %v2461_v32 }
 0x44b   :  { %819 = vmatpush1.bf16.msra.mxu0 %v2443_v29  ;;  %860 = vmatpush1.bf16.msra.mxu1 %v2470_v34 }
 0x44c   :  { %915 = vmatprep.subr.bf16.mxu0 %v2276_v0  ;;  %956 = vmatprep.subr.bf16.mxu1 %v2306_v6 }
 0x501   :  { %v727_v35 = vpop.f32.mrb[16].mxu0  ;;  %v768_v37 = vpop.f32.mrb[16].mxu1 }
 0x502   :  { %v1815_v43 = vmul.f32 -1.442695, %v727_v35  ;;  %v729_v44 = vpop.f32.mrb[17].mxu0  ;;  %v770_v45 = vpop.f32.mrb[17].mxu1 }
 0x503   :  { %v1816_v46 = vmul.f32 -1.442695, %v729_v44  ;;  %v731_v47 = vpop.f32.mrb[18].mxu0  ;;  %v772_v48 = vpop.f32.mrb[18].mxu1  ;;  %v1817_v51 = vmul.f32 -1.442695, %v770_v45 }
 0x504   :  { %2053 = vpow2.f32 %v1815_v43  ;;  %v732_v49 = vpop.f32.mrb[19].mxu0  ;;  %v773_v50 = vpop.f32.mrb[19].mxu1 }
 0x505   :  { %2055 = vpow2.f32 %v1816_v46  ;;  %v1822_v46 = vld [vmem:[%s3234_s0 + $0xc] sm:$0x3]  ;;  %v2769_v50 = vld [vmem:[%s3231_s3] ss:$16 sps:$4 sm:$0xff]  }
 0x506   :  { %2057 = vpow2.f32 %v1817_v51  ;;  %v2775_v51 = vld [vmem:[%s3231_s3 + $0x8] ss:$16 sps:$4 sm:$0xff]  }
 0x507   :  { %2059 = vtanh.f32 %v768_v37 }
 0x50e   :  { %v2054_v52 = vpop.eup %2053 }
 0x50f   :  { %v2056_v54 = vpop.eup %2055  ;;  %v778_v55 = vadd.f32 1.0, %v2054_v52  ;;  %v2781_v52 = vld [vmem:[%s3231_s3 + $0x24] ss:$16 sps:$4 sm:$0xff]  }
 0x510   :  { %v784_v0 = vadd.f32 1.0, %v2056_v54  ;;  %v2058_v56 = vpop.eup %2057  ;;  %v2787_v54 = vld [vmem:[%s3231_s3 + $0x2c] ss:$16 sps:$4 sm:$0xff]  }
 0x511   :  { %2061 = vrcp.f32 %v778_v55  ;;  %v2060_v57 = vpop.eup %2059  ;;  %v791_v62 = vadd.f32 1.0, %v2058_v56  ;;  %v2795_v55 = vld [vmem:[%s3231_s3 + $0x20] ss:$16 sps:$4 sm:$0xff]   ;;  %v2807_v56 = vld [vmem:[%s3231_s3 + $0x44] ss:$16 sps:$4 sm:$0xff]  }
 0x512   :  { %2063 = vrcp.f32 %v784_v0  ;;  %v2801_v0 = vld [vmem:[%s3231_s3 + $0x28] ss:$16 sps:$4 sm:$0xff]  }
 0x513   :  { %2065 = vrcp.f32 %v791_v62  ;;  %v2837_v62 = vld [vmem:[%s3231_s3 + $0x6c] ss:$16 sps:$4 sm:$0xff]  }
 0x51b   :  { %v2062_v58 = vpop.eup %2061 }
 0x51c   :  { %v2064_v59 = vpop.eup %2063  ;;  %v795_v60 = vmul.f32 %v2062_v58, %v2060_v57  ;;  %v2813_v57 = vld [vmem:[%s3231_s3 + $0x4c] ss:$16 sps:$4 sm:$0xff]   ;;  %v2819_v58 = vld [vmem:[%s3231_s3 + $0x40] ss:$16 sps:$4 sm:$0xff]  }
 0x51d   :  { %v794_v33 = vmul.f32 %v2064_v59, %v2664_v38  ;;  %v2066_v30 = vpop.eup %2065  ;;  %v2825_v59 = vld [vmem:[%s3231_s3 + $0x48] ss:$16 sps:$4 sm:$0xff]  }
 0x51f   :  { %v2707_v36 = vadd.f32 %v795_v60, %v794_v33  ;;  %v2831_v60 = vld [vmem:[%s3231_s3 + $0x64] ss:$16 sps:$4 sm:$0xff]   ;;  %v2843_v33 = vld [vmem:[%s3231_s3 + $0x60] ss:$16 sps:$4 sm:$0xff]  }
 0x521   :  { %2067 = vtanh.f32 %v2707_v36  ;;  %v802_v42 = vsel %vm73_vm1, %v2707_v36, %v2664_v38  ;;  %v2849_v36 = vld [vmem:[%s3231_s3 + $0x68] ss:$16 sps:$4 sm:$0xff]  }
 0x52b   :  { %v2068_v40 = vpop.eup %2067 }
 0x52c   :  { %v798_v41 = vmul.f32 %v2068_v40, %v2066_v30  ;;  %v2855_v30 = vld [vmem:[%s3231_s3 + $0x84] ss:$16 sps:$4 sm:$0xff]   ;;  %v2861_v40 = vld [vmem:[%s3231_s3 + $0x8c] ss:$16 sps:$4 sm:$0xff]  }
 0x52e   :  { %v801_v63 = vsel %vm73_vm1, %v798_v41, %v1818_v61  ;;  %v2867_v61 = vld [vmem:[%s3231_s3 + $0x80] ss:$16 sps:$4 sm:$0xff]   ;;  %v2874_v41 = vld [vmem:[%s3231_s3 + $0xa4] ss:$16 sps:$4 sm:$0xff]  }
 0x52f   :  { %v803_v39 = vpack.c.bf16 %v801_v63, %v801_v63  ;;  %v2881_v63 = vld [vmem:[%s3231_s3 + $0xa0] ss:$16 sps:$4 sm:$0xff]  }
 0x531   :  { %837 = vmatmul.mubr.bf16.vlgmr.msra.gmra.mrb[20].mxu0 %v803_v39  ;;  %878 = vmatmul.mubr.bf16.vlgmr.msra.gmra.mrb[20].mxu1 %v803_v39 }
 0x532   :  { %916 = vmatpush1.bf16.msra.mxu0 %v2283_v2  ;;  %957 = vmatpush1.bf16.msra.mxu1 %v2311_v7  ;;  %v2750_v2 = vld [vmem:[%s3231_s3 + $0x4] ss:$16 sps:$4 sm:$0xff]  }
 0x533   :  { %917 = vmatprep.subr.bf16.mxu0 %v2289_v3  ;;  %958 = vmatprep.subr.bf16.mxu1 %v2330_v10 }
 0x534   :  { %947 = vmatprep.mubr.bf16.mxu0 %v2213_v1  ;;  %988 = vmatprep.mubr.bf16.mxu1 %v2213_v1 }
 0x536   :  { %918 = vmatpush1.bf16.msra.mxu0 %v2295_v4  ;;  %959 = vmatpush1.bf16.msra.mxu1 %v2335_v11 }
 0x537   :  { %919 = vmatprep.subr.bf16.mxu0 %v2301_v5  ;;  %960 = vmatprep.subr.bf16.mxu1 %v2352_v14 }
 0x53a   :  { %920 = vmatpush1.bf16.msra.mxu0 %v2317_v8  ;;  %961 = vmatpush1.bf16.msra.mxu1 %v2359_v15 }
 0x53b   :  { %921 = vmatprep.subr.bf16.mxu0 %v2324_v9  ;;  %962 = vmatprep.subr.bf16.mxu1 %v2365_v16 }
 0x53e   :  { %922 = vmatpush1.bf16.msra.mxu0 %v2342_v12  ;;  %963 = vmatpush1.bf16.msra.mxu1 %v2383_v19 }
 0x53f   :  { %923 = vmatprep.subr.bf16.mxu0 %v2347_v13  ;;  %964 = vmatprep.subr.bf16.mxu1 %v2389_v20 }
 0x542   :  { %924 = vmatpush1.bf16.msra.mxu0 %v2371_v17  ;;  %965 = vmatpush1.bf16.msra.mxu1 %v2407_v23 }
 0x543   :  { %925 = vmatprep.subr.bf16.mxu0 %v2377_v18  ;;  %966 = vmatprep.subr.bf16.mxu1 %v2413_v24 }
 0x546   :  { %926 = vmatpush1.bf16.msra.mxu0 %v2395_v21  ;;  %967 = vmatpush1.bf16.msra.mxu1 %v2431_v27 }
 0x547   :  { %927 = vmatprep.subr.bf16.mxu0 %v2401_v22  ;;  %968 = vmatprep.subr.bf16.mxu1 %v2437_v28 }
 0x54a   :  { %928 = vmatpush1.bf16.msra.mxu0 %v2419_v25  ;;  %969 = vmatpush1.bf16.msra.mxu1 %v2455_v31 }
 0x54b   :  { %929 = vmatprep.subr.bf16.mxu0 %v2425_v26  ;;  %970 = vmatprep.subr.bf16.mxu1 %v2461_v32 }
 0x54e   :  { %930 = vmatpush1.bf16.msra.mxu0 %v2443_v29  ;;  %971 = vmatpush1.bf16.msra.mxu1 %v2470_v34 }
 0x54f   :  { %1026 = vmatprep.subr.bf16.mxu0 %v2750_v2  ;;  %1067 = vmatprep.subr.bf16.mxu1 %v2306_v6 }
 0x604   :  { %v838_v3 = vpop.f32.mrb[20].mxu0  ;;  %v879_v4 = vpop.f32.mrb[20].mxu1 }
 0x605   :  { %v1819_v5 = vmul.f32 -1.442695, %v838_v3  ;;  %v840_v7 = vpop.f32.mrb[21].mxu0  ;;  %v881_v8 = vpop.f32.mrb[21].mxu1 }
 0x606   :  { %v1820_v9 = vmul.f32 -1.442695, %v840_v7  ;;  %v842_v10 = vpop.f32.mrb[22].mxu0  ;;  %v883_v11 = vpop.f32.mrb[22].mxu1  ;;  %v1821_v14 = vmul.f32 -1.442695, %v881_v8 }
 0x607   :  { %2069 = vpow2.f32 %v1819_v5  ;;  %v843_v12 = vpop.f32.mrb[23].mxu0  ;;  %v884_v13 = vpop.f32.mrb[23].mxu1 }
 0x608   :  { %2071 = vpow2.f32 %v1820_v9 }
 0x609   :  { %2073 = vpow2.f32 %v1821_v14 }
 0x60a   :  { %2075 = vtanh.f32 %v879_v4 }
 0x611   :  { %v2070_v15 = vpop.eup %2069 }
 0x612   :  { %v2072_v16 = vpop.eup %2071  ;;  %v889_v17 = vadd.f32 1.0, %v2070_v15 }
 0x613   :  { %v895_v18 = vadd.f32 1.0, %v2072_v16  ;;  %v2074_v6 = vpop.eup %2073 }
 0x614   :  { %2077 = vrcp.f32 %v889_v17  ;;  %v2076_v19 = vpop.eup %2075  ;;  %v902_v35 = vadd.f32 1.0, %v2074_v6 }
 0x615   :  { %2079 = vrcp.f32 %v895_v18 }
 0x616   :  { %2081 = vrcp.f32 %v902_v35  ;;  %v2942_v35 = vld [vmem:[%s3231_s3 + $0x88] ss:$16 sps:$4 sm:$0xff]  }
 0x61e   :  { %v2078_v20 = vpop.eup %2077 }
 0x61f   :  { %v2080_v21 = vpop.eup %2079  ;;  %v906_v22 = vmul.f32 %v2078_v20, %v2076_v19  ;;  %v2915_v20 = vld [vmem:[%s3234_s0 + $0xe] sm:$0x3] }
 0x620   :  { %v905_v37 = vmul.f32 %v2080_v21, %v802_v42  ;;  %v2082_v44 = vpop.eup %2081 }
 0x622   :  { %v2758_v43 = vadd.f32 %v906_v22, %v905_v37  ;;  %v2949_v37 = vld [vmem:[%s3231_s3 + $0xac] ss:$16 sps:$4 sm:$0xff]  }
 0x624   :  { %2083 = vtanh.f32 %v2758_v43  ;;  %v913_v15 = vsel %vm73_vm1, %v2758_v43, %v2664_v38  ;;  %v2956_v43 = vld [vmem:[%s3231_s3 + $0xa8] ss:$16 sps:$4 sm:$0xff]  }
 0x62e   :  { %v2084_v45 = vpop.eup %2083 }
 0x62f   :  { %v909_v47 = vmul.f32 %v2084_v45, %v2082_v44  ;;  %v2963_v44 = vld [vmem:[%s3231_s3 + $0xcc] ss:$16 sps:$4 sm:$0xff]   ;;  %v2969_v45 = vld [vmem:[%s3231_s3 + $0xc0] ss:$16 sps:$4 sm:$0xff]  }
 0x631   :  { %v912_v48 = vsel %vm73_vm1, %v909_v47, %v1822_v46  ;;  %v2975_v46 = vld [vmem:[%s3231_s3 + $0xc8] ss:$16 sps:$4 sm:$0xff]   ;;  %v2981_v47 = vld [vmem:[%s3231_s3 + $0xe4] ss:$16 sps:$4 sm:$0xff]  }
 0x632   :  { %v914_v49 = vpack.c.bf16 %v912_v48, %v912_v48  ;;  %v2987_v48 = vld [vmem:[%s3231_s3 + $0xec] ss:$16 sps:$4 sm:$0xff]  }
 0x634   :  { %948 = vmatmul.mubr.bf16.vlgmr.msra.gmra.mrb[24].mxu0 %v914_v49  ;;  %989 = vmatmul.mubr.bf16.vlgmr.msra.gmra.mrb[24].mxu1 %v914_v49  ;;  %v2993_v49 = vld [vmem:[%s3231_s3 + $0xe0] ss:$16 sps:$4 sm:$0xff]  }
 0x635   :  { %1027 = vmatpush1.bf16.msra.mxu0 %v2769_v50  ;;  %1068 = vmatpush1.bf16.msra.mxu1 %v2775_v51 }
 0x636   :  { %1028 = vmatprep.subr.bf16.mxu0 %v2781_v52  ;;  %1069 = vmatprep.subr.bf16.mxu1 %v2787_v54 }
 0x637   :  { %1058 = vmatprep.mubr.bf16.mxu0 %v2213_v1  ;;  %1099 = vmatprep.mubr.bf16.mxu1 %v2213_v1 }
 0x639   :  { %1029 = vmatpush1.bf16.msra.mxu0 %v2795_v55  ;;  %1070 = vmatpush1.bf16.msra.mxu1 %v2801_v0 }
 0x63a   :  { %1030 = vmatprep.subr.bf16.mxu0 %v2807_v56  ;;  %1071 = vmatprep.subr.bf16.mxu1 %v2813_v57 }
 0x63d   :  { %1031 = vmatpush1.bf16.msra.mxu0 %v2819_v58  ;;  %1072 = vmatpush1.bf16.msra.mxu1 %v2825_v59 }
 0x63e   :  { %1032 = vmatprep.subr.bf16.mxu0 %v2831_v60  ;;  %1073 = vmatprep.subr.bf16.mxu1 %v2837_v62 }
 0x641   :  { %1033 = vmatpush1.bf16.msra.mxu0 %v2843_v33  ;;  %1074 = vmatpush1.bf16.msra.mxu1 %v2849_v36 }
 0x642   :  { %1034 = vmatprep.subr.bf16.mxu0 %v2855_v30  ;;  %1075 = vmatprep.subr.bf16.mxu1 %v2861_v40 }
 0x645   :  { %1035 = vmatpush1.bf16.msra.mxu0 %v2867_v61  ;;  %1076 = vmatpush1.bf16.msra.mxu1 %v2407_v23  ;;  %v2888_v23 = vld [vmem:[%s3231_s3 + $0xc4] ss:$16 sps:$4 sm:$0xff]  }
 0x646   :  { %1036 = vmatprep.subr.bf16.mxu0 %v2874_v41  ;;  %1077 = vmatprep.subr.bf16.mxu1 %v2413_v24  ;;  %v2902_v24 = vld [vmem:[%s3231_s3 + $0xc] ss:$16 sps:$4 sm:$0xff]  }
 0x649   :  { %1037 = vmatpush1.bf16.msra.mxu0 %v2881_v63  ;;  %1078 = vmatpush1.bf16.msra.mxu1 %v2431_v27 }
 0x64a   :  { %1038 = vmatprep.subr.bf16.mxu0 %v2888_v23  ;;  %1079 = vmatprep.subr.bf16.mxu1 %v2437_v28 }
 0x64d   :  { %1039 = vmatpush1.bf16.msra.mxu0 %v2419_v25  ;;  %1080 = vmatpush1.bf16.msra.mxu1 %v2455_v31 }
 0x64e   :  { %1040 = vmatprep.subr.bf16.mxu0 %v2425_v26  ;;  %1081 = vmatprep.subr.bf16.mxu1 %v2461_v32 }
 0x651   :  { %1041 = vmatpush1.bf16.msra.mxu0 %v2443_v29  ;;  %1082 = vmatpush1.bf16.msra.mxu1 %v2470_v34 }
 0x652   :  { %1135 = vmatprep.subr.bf16.mxu0 %v2750_v2  ;;  %1176 = vmatprep.subr.bf16.mxu1 %v2902_v24 }
 0x707   :  { %v949_v25 = vpop.f32.mrb[24].mxu0  ;;  %v990_v27 = vpop.f32.mrb[24].mxu1 }
 0x708   :  { %v1823_v28 = vmul.f32 -1.442695, %v949_v25  ;;  %v951_v31 = vpop.f32.mrb[25].mxu0  ;;  %v992_v26 = vpop.f32.mrb[25].mxu1  ;;  %v2999_v25 = vld [vmem:[%s3231_s3 + $0xe8] ss:$16 sps:$4 sm:$0xff]  }
 0x709   :  { %v1824_v39 = vmul.f32 -1.442695, %v951_v31  ;;  %v953_v32 = vpop.f32.mrb[26].mxu0  ;;  %v994_v3 = vpop.f32.mrb[26].mxu1  ;;  %v1825_v4 = vmul.f32 -1.442695, %v992_v26 }
 0x70a   :  { %2085 = vpow2.f32 %v1823_v28  ;;  %v954_v29 = vpop.f32.mrb[27].mxu0  ;;  %v995_v34 = vpop.f32.mrb[27].mxu1 }
 0x70b   :  { %2087 = vpow2.f32 %v1824_v39 }
 0x70c   :  { %2089 = vpow2.f32 %v1825_v4 }
 0x70d   :  { %2091 = vtanh.f32 %v990_v27 }
 0x714   :  { %v2086_v5 = vpop.eup %2085 }
 0x715   :  { %v2088_v7 = vpop.eup %2087  ;;  %v1000_v8 = vadd.f32 1.0, %v2086_v5 }
 0x716   :  { %v1006_v9 = vadd.f32 1.0, %v2088_v7  ;;  %v2090_v10 = vpop.eup %2089 }
 0x717   :  { %2093 = vrcp.f32 %v1000_v8  ;;  %v2092_v11 = vpop.eup %2091  ;;  %v1013_v16 = vadd.f32 1.0, %v2090_v10 }
 0x718   :  { %2095 = vrcp.f32 %v1006_v9 }
 0x719   :  { %2097 = vrcp.f32 %v1013_v16 }
 0x721   :  { %v2094_v12 = vpop.eup %2093 }
 0x722   :  { %v2096_v13 = vpop.eup %2095  ;;  %v1017_v14 = vmul.f32 %v2094_v12, %v2092_v11 }
 0x723   :  { %v1016_v17 = vmul.f32 %v2096_v13, %v913_v15  ;;  %v2098_v6 = vpop.eup %2097 }
 0x725   :  { %v2909_v18 = vadd.f32 %v1017_v14, %v1016_v17 }
 0x727   :  { %2099 = vtanh.f32 %v2909_v18  ;;  %v1024_v16 = vsel %vm73_vm1, %v2909_v18, %v2664_v38 }
 0x731   :  { %v2100_v19 = vpop.eup %2099 }
 0x732   :  { %v1020_v21 = vmul.f32 %v2100_v19, %v2098_v6 }
 0x734   :  { %v1023_v22 = vsel %vm73_vm1, %v1020_v21, %v2915_v20 }
 0x735   :  { %v1025_v42 = vpack.c.bf16 %v1023_v22, %v1023_v22 }
 0x737   :  { %1059 = vmatmul.mubr.bf16.vlgmr.msra.gmra.mrb[28].mxu0 %v1025_v42  ;;  %1100 = vmatmul.mubr.bf16.vlgmr.msra.gmra.mrb[28].mxu1 %v1025_v42 }
 0x738   :  { %1136 = vmatpush1.bf16.msra.mxu0 %v2769_v50  ;;  %1177 = vmatpush1.bf16.msra.mxu1 %v2775_v51 }
 0x739   :  { %1137 = vmatprep.subr.bf16.mxu0 %v2781_v52  ;;  %1178 = vmatprep.subr.bf16.mxu1 %v2787_v54 }
 0x73a   :  { %1167 = vmatprep.mubr.bf16.mxu0 %v2213_v1  ;;  %1208 = vmatprep.mubr.bf16.mxu1 %v2213_v1 }
 0x73c   :  { %1138 = vmatpush1.bf16.msra.mxu0 %v2795_v55  ;;  %1179 = vmatpush1.bf16.msra.mxu1 %v2801_v0 }
 0x73d   :  { %1139 = vmatprep.subr.bf16.mxu0 %v2807_v56  ;;  %1180 = vmatprep.subr.bf16.mxu1 %v2813_v57 }
 0x740   :  { %1140 = vmatpush1.bf16.msra.mxu0 %v2819_v58  ;;  %1181 = vmatpush1.bf16.msra.mxu1 %v2825_v59 }
 0x741   :  { %1141 = vmatprep.subr.bf16.mxu0 %v2831_v60  ;;  %1182 = vmatprep.subr.bf16.mxu1 %v2837_v62 }
 0x744   :  { %1142 = vmatpush1.bf16.msra.mxu0 %v2843_v33  ;;  %1183 = vmatpush1.bf16.msra.mxu1 %v2849_v36 }
 0x745   :  { %1143 = vmatprep.subr.bf16.mxu0 %v2855_v30  ;;  %1184 = vmatprep.subr.bf16.mxu1 %v2861_v40 }
 0x748   :  { %1144 = vmatpush1.bf16.msra.mxu0 %v2867_v61  ;;  %1185 = vmatpush1.bf16.msra.mxu1 %v2942_v35 }
 0x749   :  { %1145 = vmatprep.subr.bf16.mxu0 %v2874_v41  ;;  %1186 = vmatprep.subr.bf16.mxu1 %v2949_v37 }
 0x74c   :  { %1146 = vmatpush1.bf16.msra.mxu0 %v2881_v63  ;;  %1187 = vmatpush1.bf16.msra.mxu1 %v2956_v43 }
 0x74d   :  { %1147 = vmatprep.subr.bf16.mxu0 %v2888_v23  ;;  %1188 = vmatprep.subr.bf16.mxu1 %v2963_v44 }
 0x750   :  { %1148 = vmatpush1.bf16.msra.mxu0 %v2969_v45  ;;  %1189 = vmatpush1.bf16.msra.mxu1 %v2975_v46 }
 0x751   :  { %1149 = vmatprep.subr.bf16.mxu0 %v2981_v47  ;;  %1190 = vmatprep.subr.bf16.mxu1 %v2987_v48 }
 0x754   :  { %1150 = vmatpush1.bf16.msra.mxu0 %v2993_v49  ;;  %1191 = vmatpush1.bf16.msra.mxu1 %v2999_v25 }
 0x755   :  { %1244 = vmatprep.subr.bf16.mxu0 %v2750_v2  ;;  %1285 = vmatprep.subr.bf16.mxu1 %v2902_v24 }
 0x80a   :  { %v1060_v27 = vpop.f32.mrb[28].mxu0  ;;  %v1101_v28 = vpop.f32.mrb[28].mxu1 }
 0x80b   :  { %v1827_v31 = vmul.f32 -1.442695, %v1060_v27  ;;  %v1062_v26 = vpop.f32.mrb[29].mxu0  ;;  %v1103_v39 = vpop.f32.mrb[29].mxu1 }
 0x80c   :  { %v1828_v32 = vmul.f32 -1.442695, %v1062_v26  ;;  %v1064_v3 = vpop.f32.mrb[30].mxu0  ;;  %v1105_v29 = vpop.f32.mrb[30].mxu1  ;;  %v1829_v5 = vmul.f32 -1.442695, %v1103_v39 }
 0x80d   :  { %2101 = vpow2.f32 %v1827_v31  ;;  %v1065_v34 = vpop.f32.mrb[31].mxu0  ;;  %v1106_v4 = vpop.f32.mrb[31].mxu1 }
 0x80e   :  { %2103 = vpow2.f32 %v1828_v32 }
 0x80f   :  { %2105 = vpow2.f32 %v1829_v5 }
 0x810   :  { %2107 = vtanh.f32 %v1101_v28 }
 0x817   :  { %v2102_v7 = vpop.eup %2101 }
 0x818   :  { %v2104_v8 = vpop.eup %2103  ;;  %v1111_v9 = vadd.f32 1.0, %v2102_v7 }
 0x819   :  { %v1117_v10 = vadd.f32 1.0, %v2104_v8  ;;  %v2106_v11 = vpop.eup %2105 }
 0x81a   :  { %2109 = vrcp.f32 %v1111_v9  ;;  %v2108_v12 = vpop.eup %2107  ;;  %v1124_v17 = vadd.f32 1.0, %v2106_v11 }
 0x81b   :  { %2111 = vrcp.f32 %v1117_v10 }
 0x81c   :  { %2113 = vrcp.f32 %v1124_v17 }
 0x824   :  { %v2110_v13 = vpop.eup %2109 }
 0x825   :  { %v2112_v14 = vpop.eup %2111  ;;  %v1128_v15 = vmul.f32 %v2110_v13, %v2108_v12 }
 0x826   :  { %v1127_v6 = vmul.f32 %v2112_v14, %v1024_v16  ;;  %v2114_v21 = vpop.eup %2113 }
 0x828   :  { %v3008_v19 = vadd.f32 %v1128_v15, %v1127_v6 }
 0x82a   :  { %2115 = vtanh.f32 %v3008_v19  ;;  %v1133_v16 = vsel %vm73_vm1, %v3008_v19, %v2664_v38 }
 0x834   :  { %v2116_v22 = vpop.eup %2115 }
 0x835   :  { %v1131_v42 = vmul.f32 %v2116_v22, %v2114_v21 }
 0x837   :  { %v3014_v27 = vsel %vm73_vm1, %v1131_v42, %v2915_v20  ;;  %vm1675_vm1 = vcmask 80896  }
 0x838   :  { %v1134_v28 = vpack.c.bf16 %v3014_v27, %v3014_v27 }
 0x83a   :  { %1168 = vmatmul.mubr.bf16.vlgmr.msra.gmra.mrb[32].mxu0 %v1134_v28  ;;  %1209 = vmatmul.mubr.bf16.vlgmr.msra.gmra.mrb[32].mxu1 %v1134_v28 }
 0x83b   :  { %1245 = vmatpush1.bf16.msra.mxu0 %v2769_v50  ;;  %1286 = vmatpush1.bf16.msra.mxu1 %v2775_v51 }
 0x83c   :  { %1246 = vmatprep.subr.bf16.mxu0 %v2781_v52  ;;  %1287 = vmatprep.subr.bf16.mxu1 %v2787_v54 }
 0x83d   :  { %1276 = vmatprep.mubr.bf16.mxu0 %v2213_v1  ;;  %1317 = vmatprep.mubr.bf16.mxu1 %v2213_v1 }
 0x83f   :  { %1247 = vmatpush1.bf16.msra.mxu0 %v2795_v55  ;;  %1288 = vmatpush1.bf16.msra.mxu1 %v2801_v0 }
 0x840   :  { %1248 = vmatprep.subr.bf16.mxu0 %v2807_v56  ;;  %1289 = vmatprep.subr.bf16.mxu1 %v2813_v57 }
 0x843   :  { %1249 = vmatpush1.bf16.msra.mxu0 %v2819_v58  ;;  %1290 = vmatpush1.bf16.msra.mxu1 %v2825_v59 }
 0x844   :  { %1250 = vmatprep.subr.bf16.mxu0 %v2831_v60  ;;  %1291 = vmatprep.subr.bf16.mxu1 %v2837_v62 }
 0x847   :  { %1251 = vmatpush1.bf16.msra.mxu0 %v2843_v33  ;;  %1292 = vmatpush1.bf16.msra.mxu1 %v2849_v36 }
 0x848   :  { %1252 = vmatprep.subr.bf16.mxu0 %v2855_v30  ;;  %1293 = vmatprep.subr.bf16.mxu1 %v2861_v40 }
 0x84b   :  { %1253 = vmatpush1.bf16.msra.mxu0 %v2867_v61  ;;  %1294 = vmatpush1.bf16.msra.mxu1 %v2942_v35 }
 0x84c   :  { %1254 = vmatprep.subr.bf16.mxu0 %v2874_v41  ;;  %1295 = vmatprep.subr.bf16.mxu1 %v2949_v37 }
 0x84f   :  { %1255 = vmatpush1.bf16.msra.mxu0 %v2881_v63  ;;  %1296 = vmatpush1.bf16.msra.mxu1 %v2956_v43 }
 0x850   :  { %1256 = vmatprep.subr.bf16.mxu0 %v2888_v23  ;;  %1297 = vmatprep.subr.bf16.mxu1 %v2963_v44 }
 0x853   :  { %1257 = vmatpush1.bf16.msra.mxu0 %v2969_v45  ;;  %1298 = vmatpush1.bf16.msra.mxu1 %v2975_v46 }
 0x854   :  { %1258 = vmatprep.subr.bf16.mxu0 %v2981_v47  ;;  %1299 = vmatprep.subr.bf16.mxu1 %v2987_v48 }
 0x857   :  { %1259 = vmatpush1.bf16.msra.mxu0 %v2993_v49  ;;  %1300 = vmatpush1.bf16.msra.mxu1 %v2999_v25 }
 0x858   :  { %1353 = vmatprep.subr.bf16.mxu0 %v2750_v2  ;;  %1394 = vmatprep.subr.bf16.mxu1 %v2902_v24 }
 0x90d   :  { %v1169_v18 = vpop.f32.mrb[32].mxu0  ;;  %v1210_v20 = vpop.f32.mrb[32].mxu1 }
 0x90e   :  { %v1830_v31 = vmul.f32 -1.442695, %v1169_v18  ;;  %v1171_v26 = vpop.f32.mrb[33].mxu0  ;;  %v1212_v39 = vpop.f32.mrb[33].mxu1 }
 0x90f   :  { %v1831_v32 = vmul.f32 -1.442695, %v1171_v26  ;;  %v1173_v3 = vpop.f32.mrb[34].mxu0  ;;  %v1214_v29 = vpop.f32.mrb[34].mxu1  ;;  %v1832_v5 = vmul.f32 -1.442695, %v1212_v39 }
 0x910   :  { %2117 = vpow2.f32 %v1830_v31  ;;  %v1174_v34 = vpop.f32.mrb[35].mxu0  ;;  %v1215_v4 = vpop.f32.mrb[35].mxu1 }
 0x911   :  { %2119 = vpow2.f32 %v1831_v32 }
 0x912   :  { %2121 = vpow2.f32 %v1832_v5 }
 0x913   :  { %2123 = vtanh.f32 %v1210_v20 }
 0x91a   :  { %v2118_v7 = vpop.eup %2117 }
 0x91b   :  { %v2120_v8 = vpop.eup %2119  ;;  %v1220_v9 = vadd.f32 1.0, %v2118_v7 }
 0x91c   :  { %v1226_v10 = vadd.f32 1.0, %v2120_v8  ;;  %v2122_v11 = vpop.eup %2121 }
 0x91d   :  { %2125 = vrcp.f32 %v1220_v9  ;;  %v2124_v12 = vpop.eup %2123  ;;  %v1233_v17 = vadd.f32 1.0, %v2122_v11 }
 0x91e   :  { %2127 = vrcp.f32 %v1226_v10 }
 0x91f   :  { %2129 = vrcp.f32 %v1233_v17 }
 0x927   :  { %v2126_v13 = vpop.eup %2125 }
 0x928   :  { %v2128_v14 = vpop.eup %2127  ;;  %v1237_v15 = vmul.f32 %v2126_v13, %v2124_v12 }
 0x929   :  { %v1236_v6 = vmul.f32 %v2128_v14, %v1133_v16  ;;  %v2130_v42 = vpop.eup %2129 }
 0x92b   :  { %v1238_v21 = vadd.f32 %v1237_v15, %v1236_v6 }
 0x92d   :  { %2131 = vtanh.f32 %v1238_v21  ;;  %v3059_v22 = vsel %vm75_vm6, %v1238_v21, %v1133_v16 }
 0x937   :  { %v2132_v28 = vpop.eup %2131 }
 0x938   :  { %v1240_v18 = vmul.f32 %v2132_v28, %v2130_v42 }
 0x93a   :  { %v3062_v20 = vsel %vm75_vm6, %v1240_v18, %v3014_v27 }
 0x93b   :  { %v1243_v31 = vpack.c.bf16 %v3062_v20, %v3062_v20 }
 0x93d   :  { %1277 = vmatmul.mubr.bf16.vlgmr.msra.gmra.mrb[36].mxu0 %v1243_v31  ;;  %1318 = vmatmul.mubr.bf16.vlgmr.msra.gmra.mrb[36].mxu1 %v1243_v31  ;;  %v1574_v31 = vld [vmem:[%s3235_s4 + $0x10] sm:$0xff] }
 0x93e   :  { %1354 = vmatpush1.bf16.msra.mxu0 %v2769_v50  ;;  %1395 = vmatpush1.bf16.msra.mxu1 %v2775_v51 }
 0x93f   :  { %1355 = vmatprep.subr.bf16.mxu0 %v2781_v52  ;;  %1396 = vmatprep.subr.bf16.mxu1 %v2787_v54 }
 0x940   :  { %1385 = vmatprep.mubr.bf16.mxu0 %v2213_v1  ;;  %1426 = vmatprep.mubr.bf16.mxu1 %v2213_v1 }
 0x942   :  { %1356 = vmatpush1.bf16.msra.mxu0 %v2795_v55  ;;  %1397 = vmatpush1.bf16.msra.mxu1 %v2801_v0 }
 0x943   :  { %1357 = vmatprep.subr.bf16.mxu0 %v2807_v56  ;;  %1398 = vmatprep.subr.bf16.mxu1 %v2813_v57 }
 0x946   :  { %1358 = vmatpush1.bf16.msra.mxu0 %v2819_v58  ;;  %1399 = vmatpush1.bf16.msra.mxu1 %v2825_v59 }
 0x947   :  { %1359 = vmatprep.subr.bf16.mxu0 %v2831_v60  ;;  %1400 = vmatprep.subr.bf16.mxu1 %v2837_v62 }
 0x94a   :  { %1360 = vmatpush1.bf16.msra.mxu0 %v2843_v33  ;;  %1401 = vmatpush1.bf16.msra.mxu1 %v2849_v36 }
 0x94b   :  { %1361 = vmatprep.subr.bf16.mxu0 %v2855_v30  ;;  %1402 = vmatprep.subr.bf16.mxu1 %v2861_v40 }
 0x94e   :  { %1362 = vmatpush1.bf16.msra.mxu0 %v2867_v61  ;;  %1403 = vmatpush1.bf16.msra.mxu1 %v2942_v35 }
 0x94f   :  { %1363 = vmatprep.subr.bf16.mxu0 %v2874_v41  ;;  %1404 = vmatprep.subr.bf16.mxu1 %v2949_v37 }
 0x952   :  { %1364 = vmatpush1.bf16.msra.mxu0 %v2881_v63  ;;  %1405 = vmatpush1.bf16.msra.mxu1 %v2956_v43 }
 0x953   :  { %1365 = vmatprep.subr.bf16.mxu0 %v2888_v23  ;;  %1406 = vmatprep.subr.bf16.mxu1 %v2963_v44 }
 0x956   :  { %1366 = vmatpush1.bf16.msra.mxu0 %v2969_v45  ;;  %1407 = vmatpush1.bf16.msra.mxu1 %v2975_v46 }
 0x957   :  { %1367 = vmatprep.subr.bf16.mxu0 %v2981_v47  ;;  %1408 = vmatprep.subr.bf16.mxu1 %v2987_v48 }
 0x95a   :  { %1368 = vmatpush1.bf16.msra.mxu0 %v2993_v49  ;;  %1409 = vmatpush1.bf16.msra.mxu1 %v2999_v25 }
 0x95b   :  { %1462 = vmatprep.subr.bf16.mxu0 %v2750_v2  ;;  %1503 = vmatprep.subr.bf16.mxu1 %v2902_v24 }
 0xa10   :  { %v1278_v38 = vpop.f32.mrb[36].mxu0  ;;  %v1319_v19 = vpop.f32.mrb[36].mxu1 }
 0xa11   :  { %v1833_v27 = vmul.f32 -1.442695, %v1278_v38  ;;  %v1280_v26 = vpop.f32.mrb[37].mxu0  ;;  %v1321_v39 = vpop.f32.mrb[37].mxu1  ;;  %v1575_v38 = vld [vmem:[%s3235_s4 + $0x18] sm:$0xff] }
 0xa12   :  { %v1834_v32 = vmul.f32 -1.442695, %v1280_v26  ;;  %v1282_v3 = vpop.f32.mrb[38].mxu0  ;;  %v1323_v29 = vpop.f32.mrb[38].mxu1  ;;  %v1835_v5 = vmul.f32 -1.442695, %v1321_v39 }
 0xa13   :  { %2133 = vpow2.f32 %v1833_v27  ;;  %v1283_v34 = vpop.f32.mrb[39].mxu0  ;;  %v1324_v4 = vpop.f32.mrb[39].mxu1  ;;  %v1576_v27 = vld [vmem:[%s3235_s4 + $0x20] sm:$0xff]  ;;  %v1577_v26 = vld [vmem:[%s3235_s4 + $0x28] sm:$0xff]  ;;  %v1579_v3 = vld [vmem:[%s3235_s4 + $0x38] sm:$0xff] }
 0xa14   :  { %2135 = vpow2.f32 %v1834_v32  ;;  %v1915_v39 = vpack.c.bf16 %v1577_v26, %v1576_v27  ;;  %v1578_v32 = vld [vmem:[%s3235_s4 + $0x30] sm:$0xff]  ;;  %v1580_v34 = vld [vmem:[%s3235_s4 + $0x40] sm:$0xff]  ;;  %v1581_v4 = vld [vmem:[%s3235_s4 + $0x48] sm:$0xff] }
 0xa15   :  { %2137 = vpow2.f32 %v1835_v5  ;;  %v1918_v29 = vpack.c.bf16 %v1579_v3, %v1578_v32  ;;  %v1921_v5 = vpack.c.bf16 %v1581_v4, %v1580_v34 }
 0xa16   :  { %2139 = vtanh.f32 %v1319_v19  ;;  %v1912_v19 = vpack.c.bf16 %v1575_v38, %v1574_v31 }
 0xa1d   :  { %v2134_v7 = vpop.eup %2133 }
 0xa1e   :  { %v2136_v8 = vpop.eup %2135  ;;  %v1329_v9 = vadd.f32 1.0, %v2134_v7  ;;  %v2216_v7 = vmov 0.0  }
 0xa1f   :  { %v1335_v2 = vadd.f32 1.0, %v2136_v8  ;;  %v2138_v24 = vpop.eup %2137  ;;  %v1582_v8 = vld [vmem:[%s3235_s4 + $0x50] sm:$0xff] }
 0xa20   :  { %2141 = vrcp.f32 %v1329_v9  ;;  %v2140_v10 = vpop.eup %2139  ;;  %v1342_v14 = vadd.f32 1.0, %v2138_v24  ;;  %v1583_v9 = vld [vmem:[%s3235_s4 + $0x58] sm:$0xff]  ;;  %v1584_v24 = vld [vmem:[%s3235_s4 + $0x60] sm:$0xff] }
 0xa21   :  { %2143 = vrcp.f32 %v1335_v2  ;;  %v1924_v2 = vpack.c.bf16 %v1583_v9, %v1582_v8 }
 0xa22   :  { %2145 = vrcp.f32 %v1342_v14 }
 0xa2a   :  { %v2142_v11 = vpop.eup %2141 }
 0xa2b   :  { %v2144_v12 = vpop.eup %2143  ;;  %v1346_v13 = vmul.f32 %v2142_v11, %v2140_v10  ;;  %v1585_v10 = vld [vmem:[%s3235_s4 + $0x68] sm:$0xff] }
 0xa2c   :  { %v1345_v15 = vmul.f32 %v2144_v12, %v3059_v22  ;;  %v2146_v6 = vpop.eup %2145  ;;  %v1927_v11 = vpack.c.bf16 %v1585_v10, %v1584_v24  ;;  %v1586_v12 = vld [vmem:[%s3235_s4 + $0x70] sm:$0xff] }
 0xa2e   :  { %v1347_v16 = vadd.f32 %v1346_v13, %v1345_v15  ;;  %v1587_v13 = vld [vmem:[%s3235_s4 + $0x78] sm:$0xff]  ;;  %v1666_v15 = vld [vmem:[%s3236_s6] sm:$0xff] }
 0xa2f   :  { %v1930_v14 = vpack.c.bf16 %v1587_v13, %v1586_v12 }
 0xa30   :  { %2147 = vtanh.f32 %v1347_v16  ;;  %v3105_v17 = vsel %vm77_vm8, %v1347_v16, %v3059_v22  ;;  %v1667_v16 = vld [vmem:[%s3236_s6 + $0x8] sm:$0x3] }
 0xa3a   :  { %v2148_v21 = vpop.eup %2147 }
 0xa3b   :  { %v1349_v42 = vmul.f32 %v2148_v21, %v2146_v6 }
 0xa3d   :  { %v3108_v28 = vsel %vm77_vm8, %v1349_v42, %v3062_v20  ;;  %v2214_v20 = vmov 0.0|0.0  }
 0xa3e   :  { %v1352_v18 = vpack.c.bf16 %v3108_v28, %v3108_v28 }
 0xa40   :  { %1386 = vmatmul.mubr.bf16.vlgmr.msra.gmra.mrb[40].mxu0 %v1352_v18  ;;  %1427 = vmatmul.mubr.bf16.vlgmr.msra.gmra.mrb[40].mxu1 %v1352_v18 }
 0xa41   :  { %1463 = vmatpush1.bf16.msra.mxu0 %v2769_v50  ;;  %1504 = vmatpush1.bf16.msra.mxu1 %v2775_v51 }
 0xa42   :  { %1464 = vmatprep.subr.bf16.mxu0 %v2781_v52  ;;  %1505 = vmatprep.subr.bf16.mxu1 %v2787_v54 }
 0xa43   :  { %1494 = vmatprep.mubr.bf16.mxu0 %v2213_v1  ;;  %1535 = vmatprep.mubr.bf16.mxu1 %v2213_v1 }
 0xa45   :  { %1465 = vmatpush1.bf16.msra.mxu0 %v2795_v55  ;;  %1506 = vmatpush1.bf16.msra.mxu1 %v2801_v0 }
 0xa46   :  { %1466 = vmatprep.subr.bf16.mxu0 %v2807_v56  ;;  %1507 = vmatprep.subr.bf16.mxu1 %v2813_v57 }
 0xa49   :  { %1467 = vmatpush1.bf16.msra.mxu0 %v2819_v58  ;;  %1508 = vmatpush1.bf16.msra.mxu1 %v2825_v59 }
 0xa4a   :  { %1468 = vmatprep.subr.bf16.mxu0 %v2831_v60  ;;  %1509 = vmatprep.subr.bf16.mxu1 %v2837_v62 }
 0xa4d   :  { %1469 = vmatpush1.bf16.msra.mxu0 %v2843_v33  ;;  %1510 = vmatpush1.bf16.msra.mxu1 %v2849_v36 }
 0xa4e   :  { %1470 = vmatprep.subr.bf16.mxu0 %v2855_v30  ;;  %1511 = vmatprep.subr.bf16.mxu1 %v2861_v40 }
 0xa51   :  { %1471 = vmatpush1.bf16.msra.mxu0 %v2867_v61  ;;  %1512 = vmatpush1.bf16.msra.mxu1 %v2942_v35 }
 0xa52   :  { %1472 = vmatprep.subr.bf16.mxu0 %v2874_v41  ;;  %1513 = vmatprep.subr.bf16.mxu1 %v2949_v37 }
 0xa55   :  { %1473 = vmatpush1.bf16.msra.mxu0 %v2881_v63  ;;  %1514 = vmatpush1.bf16.msra.mxu1 %v2956_v43 }
 0xa56   :  { %1474 = vmatprep.subr.bf16.mxu0 %v2888_v23  ;;  %1515 = vmatprep.subr.bf16.mxu1 %v2963_v44 }
 0xa59   :  { %1475 = vmatpush1.bf16.msra.mxu0 %v2969_v45  ;;  %1516 = vmatpush1.bf16.msra.mxu1 %v2975_v46 }
 0xa5a   :  { %1476 = vmatprep.subr.bf16.mxu0 %v2981_v47  ;;  %1517 = vmatprep.subr.bf16.mxu1 %v2987_v48 }
 0xa5d   :  { %1477 = vmatpush1.bf16.msra.mxu0 %v2993_v49  ;;  %1518 = vmatpush1.bf16.msra.mxu1 %v2999_v25  ;;  %v1572_v49 = vld [vmem:[%s3235_s4] sm:$0xff]  ;;  %v1573_v25 = vld [vmem:[%s3235_s4 + $0x8] sm:$0xff] }
 0xa5e   :  { %v1909_v22 = vpack.c.bf16 %v1573_v25, %v1572_v49  ;;  %1908 = vmatprep.subr.bf16.mxu0 %v2214_v20  ;;  %1932 = vmatprep.subr.bf16.mxu1 %v2214_v20 }
 0xb13   :  { %v1387_v1 = vpop.f32.mrb[40].mxu0  ;;  %v1428_v50 = vpop.f32.mrb[40].mxu1 }
 0xb14   :  { %v1836_v51 = vmul.f32 -1.442695, %v1387_v1  ;;  %v1389_v52 = vpop.f32.mrb[41].mxu0  ;;  %v1430_v54 = vpop.f32.mrb[41].mxu1 }
 0xb15   :  { %v1837_v55 = vmul.f32 -1.442695, %v1389_v52  ;;  %v1391_v0 = vpop.f32.mrb[42].mxu0  ;;  %v1432_v56 = vpop.f32.mrb[42].mxu1  ;;  %v1838_v59 = vmul.f32 -1.442695, %v1430_v54 }
 0xb16   :  { %2149 = vpow2.f32 %v1836_v51  ;;  %v1392_v57 = vpop.f32.mrb[43].mxu0  ;;  %v1433_v58 = vpop.f32.mrb[43].mxu1 }
 0xb17   :  { %2151 = vpow2.f32 %v1837_v55 }
 0xb18   :  { %2153 = vpow2.f32 %v1838_v59 }
 0xb19   :  { %2155 = vtanh.f32 %v1428_v50 }
 0xb20   :  { %v2150_v60 = vpop.eup %2149 }
 0xb21   :  { %v2152_v62 = vpop.eup %2151  ;;  %v1438_v33 = vadd.f32 1.0, %v2150_v60 }
 0xb22   :  { %v1444_v36 = vadd.f32 1.0, %v2152_v62  ;;  %v2154_v30 = vpop.eup %2153 }
 0xb23   :  { %2157 = vrcp.f32 %v1438_v33  ;;  %v2156_v40 = vpop.eup %2155  ;;  %v1451_v23 = vadd.f32 1.0, %v2154_v30 }
 0xb24   :  { %2159 = vrcp.f32 %v1444_v36 }
 0xb25   :  { %2161 = vrcp.f32 %v1451_v23 }
 0xb2d   :  { %v2158_v61 = vpop.eup %2157 }
 0xb2e   :  { %v2160_v41 = vpop.eup %2159  ;;  %v1455_v63 = vmul.f32 %v2158_v61, %v2156_v40 }
 0xb2f   :  { %v1454_v35 = vmul.f32 %v2160_v41, %v3105_v17  ;;  %v2162_v44 = vpop.eup %2161 }
 0xb31   :  { %v1456_v37 = vadd.f32 %v1455_v63, %v1454_v35 }
 0xb33   :  { %2163 = vtanh.f32 %v1456_v37  ;;  %v3149_v43 = vsel %vm79_vm10, %v1456_v37, %v3105_v17  ;;  %v1933_v17 = vpack.c.bf16 %v1667_v16, %v1666_v15 }
 0xb3d   :  { %v2164_v45 = vpop.eup %2163 }
 0xb3e   :  { %v1458_v46 = vmul.f32 %v2164_v45, %v2162_v44 }
 0xb40   :  { %v3152_v47 = vsel %vm79_vm10, %v1458_v46, %v3108_v28 }
 0xb41   :  { %v1461_v48 = vpack.c.bf16 %v3152_v47, %v3152_v47 }
 0xb43   :  { %1495 = vmatmul.mubr.bf16.vlgmr.msra.gmra.mrb[44].mxu0 %v1461_v48  ;;  %1536 = vmatmul.mubr.bf16.vlgmr.msra.gmra.mrb[44].mxu1 %v1461_v48 }
 0xb44   :  { %1910 = vmatpush3.bf16.msra.mxu0 %v1909_v22  ;;  %1898 = vmatprep.mubr.msk.f32.mxu0 %vm2215_vm11, %v2216_v7 }
 0xb45   :  { %1911 = vmatprep.subr.bf16.mxu0 %v2214_v20  ;;  %1905 = vmatprep.mubr.msk.f32.mxu1 %vm2215_vm11, %v2216_v7 }
 0xb46   :  { %1935 = vmatpush3.bf16.msk.msra.mxu1 %vm1934_vm14, %v1933_v17 }
 0xb48   :  { %1913 = vmatpush3.bf16.msra.mxu0 %v1912_v19 }
 0xb49   :  { %1914 = vmatprep.subr.bf16.mxu0 %v2214_v20 }
 0xb4c   :  { %1916 = vmatpush3.bf16.msra.mxu0 %v1915_v39 }
 0xb4d   :  { %1917 = vmatprep.subr.bf16.mxu0 %v2214_v20 }
 0xb50   :  { %1919 = vmatpush3.bf16.msra.mxu0 %v1918_v29 }
 0xb51   :  { %1920 = vmatprep.subr.bf16.mxu0 %v2214_v20 }
 0xb54   :  { %1922 = vmatpush3.bf16.msra.mxu0 %v1921_v5 }
 0xb55   :  { %1923 = vmatprep.subr.bf16.mxu0 %v2214_v20 }
 0xb58   :  { %1925 = vmatpush3.bf16.msra.mxu0 %v1924_v2 }
 0xb59   :  { %1926 = vmatprep.subr.bf16.mxu0 %v2214_v20 }
 0xb5c   :  { %1928 = vmatpush3.bf16.msra.mxu0 %v1927_v11 }
 0xb5d   :  { %1929 = vmatprep.subr.bf16.mxu0 %v2214_v20 }
 0xb60   :  { %1931 = vmatpush3.bf16.msra.mxu0 %v1930_v14 }
 0xc16   :  { %v1496_v6 = vpop.f32.mrb[44].mxu0  ;;  %v1537_v21 = vpop.f32.mrb[44].mxu1 }
 0xc17   :  { %v1839_v42 = vmul.f32 -1.442695, %v1496_v6  ;;  %v1498_v28 = vpop.f32.mrb[45].mxu0  ;;  %v1539_v18 = vpop.f32.mrb[45].mxu1 }
 0xc18   :  { %v1840_v1 = vmul.f32 -1.442695, %v1498_v28  ;;  %v1500_v50 = vpop.f32.mrb[46].mxu0  ;;  %v1541_v51 = vpop.f32.mrb[46].mxu1  ;;  %v1841_v55 = vmul.f32 -1.442695, %v1539_v18 }
 0xc19   :  { %2165 = vpow2.f32 %v1839_v42  ;;  %v1501_v52 = vpop.f32.mrb[47].mxu0  ;;  %v1542_v54 = vpop.f32.mrb[47].mxu1 }
 0xc1a   :  { %2167 = vpow2.f32 %v1840_v1 }
 0xc1b   :  { %2169 = vpow2.f32 %v1841_v55 }
 0xc1c   :  { %2171 = vtanh.f32 %v1537_v21 }
 0xc23   :  { %v2166_v0 = vpop.eup %2165 }
 0xc24   :  { %v2168_v56 = vpop.eup %2167  ;;  %v1547_v57 = vadd.f32 1.0, %v2166_v0 }
 0xc25   :  { %v1553_v58 = vadd.f32 1.0, %v2168_v56  ;;  %v2170_v59 = vpop.eup %2169 }
 0xc26   :  { %2173 = vrcp.f32 %v1547_v57  ;;  %v2172_v60 = vpop.eup %2171  ;;  %v1560_v30 = vadd.f32 1.0, %v2170_v59 }
 0xc27   :  { %2175 = vrcp.f32 %v1553_v58 }
 0xc28   :  { %2177 = vrcp.f32 %v1560_v30 }
 0xc30   :  { %v2174_v62 = vpop.eup %2173 }
 0xc31   :  { %v2176_v33 = vpop.eup %2175  ;;  %v1564_v36 = vmul.f32 %v2174_v62, %v2172_v60 }
 0xc32   :  { %v1563_v40 = vmul.f32 %v2176_v33, %v3149_v43  ;;  %v2178_v63 = vpop.eup %2177 }
 0xc34   :  { %v1565_v61 = vadd.f32 %v1564_v36, %v1563_v40 }
 0xc36   :  { %2179 = vtanh.f32 %v1565_v61  ;;  %v1569_v41 = vsel %vm81_vm0, %v1565_v61, %v3149_v43  ;;  %v1842_v43 = vld [vmem:[%s3240_s5] ss:$0 sm:$0xff] }
 0xc37   :  { %1571 = vst [vmem:[%s3237_s10] sm:$0x3] %v1569_v41 }
 0xc40   :  { %v2180_v23 = vpop.eup %2179 }
 0xc41   :  { %v1567_v35 = vmul.f32 %v2180_v23, %v2178_v63 }
 0xc43   :  { %v1568_v37 = vsel %vm81_vm0, %v1567_v35, %v3152_v47  ;;  %v1843_v47 = vld [vmem:[#allocation2] ss:$0 sm:$0xff] }
 0xc44   :  { %1570 = vst [vmem:[%s3238_s9] sm:$0x3] %v1568_v37  ;;  %1899 = vmatmul.mubr.f32.vlgmr.msra.gmra.mrb[48].mxu0 %v1568_v37 }
 0xd17   :  { %v1661_v44 = vpop.f32.mrb[48].mxu0 }
 0xd18   :  { %v1662_v45 = vadd.f32 %v1842_v43, %v1661_v44  ;;  %v1900_v46 = vpop.f32.mrb[49].mxu0 }
 0xd1a   :  { %v1665_v48 = vmax.f32 %v1662_v45, 0.0 }
 0xd1c   :  { %1906 = vmatmul.mubr.msk.f32.vlgmr.msra.gmra.mrb[48].mxu1 %vm1675_vm1, %v1665_v48 }
 0xdef   :  { %v1749_v49 = vpop.f32.mrb[48].mxu1 }
 0xdf0   :  { %v1750_v25 = vadd.f32 %v1843_v47, %v1749_v49  ;;  %v1907_v22 = vpop.f32.mrb[49].mxu1 }
 0xdf2   :  { %1754 = vst.msk [vmem:[%s3241_s8] sm:$0x3] %vm1753_vm2, %v1750_v25 }

</bundles_post_ra>
